<compile_context>
chip_gen: v7x
topology: tpu7x:2x2x1
jax: 0.10.0
libtpu: 0.0.40
codegen_flags: <defaults>
</compile_context>

<pallas_src>
import functools
import math

import jax
import jax.numpy as jnp
from jax.experimental import pallas as pl
from jax.experimental.pallas import tpu as pltpu


def _label_smoothing_loss_kernel(pred_ref, tgt_ref, o_ref, *, smoothing,
                                 num_classes, n_valid_rows, tile_rows):
    i = pl.program_id(0)

    @pl.when(i == 0)
    def _init():
        o_ref[...] = jnp.zeros_like(o_ref)

    pred = pred_ref[...]                                   # (TN, C) f32
    tgt = tgt_ref[...]                                     # (TN, 1) i32

    # Numerically stable log-softmax pieces (per row).
    row_max = jnp.max(pred, axis=-1, keepdims=True)                        # (TN, 1)
    sum_exp = jnp.sum(jnp.exp(pred - row_max), axis=-1, keepdims=True)     # (TN, 1)
    lse = row_max + jnp.log(sum_exp)                                       # (TN, 1)

    # sum_c log_prob[c]  and  log_prob[target]  per row.
    sum_log_prob = jnp.sum(pred, axis=-1, keepdims=True) - num_classes * lse

    col = jax.lax.broadcasted_iota(jnp.int32, pred.shape, 1)               # class id
    tgt_logit = jnp.sum(jnp.where(col == tgt, pred, 0.0),
                        axis=-1, keepdims=True)                            # (TN, 1)
    tgt_log_prob = tgt_logit - lse

    off_w = smoothing / (num_classes - 1)
    on_w = 1.0 - smoothing
    row_loss = -(off_w * (sum_log_prob - tgt_log_prob) + on_w * tgt_log_prob)

    # Mask rows that only exist because of padding (ragged last tile).
    row_idx = jax.lax.broadcasted_iota(jnp.int32, (tile_rows, 1), 0) + i * tile_rows
    row_loss = jnp.where(row_idx < n_valid_rows, row_loss, 0.0)

    # Accumulate into the resident (1, 1) output block.
    o_ref[...] += jnp.sum(row_loss, axis=0, keepdims=True)

    @pl.when(i == pl.num_programs(0) - 1)
    def _finalize():
        o_ref[...] = o_ref[...] / n_valid_rows


def label_smoothing_loss(pred, target, *, smoothing=0.1, tile_rows=None):
    """pred: (N, C) logits, target: (N,) int class ids -> scalar f32 loss."""
    pred = pred.astype(jnp.float32)
    target = target.astype(jnp.int32)
    n, c = pred.shape
    assert target.shape == (n,)

    if tile_rows is None:
        # Large row tiles amortize the ~0.35us/step grid overhead while keeping
        # a double-buffered (tile_rows, C) f32 input comfortably inside VMEM
        # (works on v7x's smaller 64 MiB VMEM as well as v5e/v6e).
        budget_bytes = 4 * 1024 * 1024                     # per pipeline buffer
        tile_rows = max(8, min(512, (budget_bytes // (c * 4)) // 8 * 8))

    num_tiles = pl.cdiv(n, tile_rows)
    n_pad = num_tiles * tile_rows - n
    if n_pad:
        pred = jnp.pad(pred, ((0, n_pad), (0, 0)))
        target = jnp.pad(target, ((0, n_pad),))
    target = target.reshape(-1, 1)

    kernel = functools.partial(
        _label_smoothing_loss_kernel,
        smoothing=float(smoothing),
        num_classes=c,
        n_valid_rows=n,
        tile_rows=tile_rows,
    )

    out = pl.pallas_call(
        kernel,
        out_shape=jax.ShapeDtypeStruct((1, 1), jnp.float32),
        grid_spec=pltpu.PrefetchScalarGridSpec(
            num_scalar_prefetch=0,
            grid=(num_tiles,),
            in_specs=[
                pl.BlockSpec((tile_rows, c), lambda i: (i, 0)),   # logits tile
                pl.BlockSpec((tile_rows, 1), lambda i: (i, 0)),   # targets tile
            ],
            out_specs=pl.BlockSpec((1, 1), lambda i: (0, 0)),     # scalar accumulator
        ),
        compiler_params=pltpu.CompilerParams(
            dimension_semantics=("arbitrary",)),                  # reduction axis
    )(pred, target)

    return out[0, 0]


if __name__ == "__main__":
    smoothing = 0.1
    n, c = 300, 512          # e.g. (batch*seq) rows, 512 classes (mult. of 128)

    key = jax.random.PRNGKey(0)
    k_pred, k_tgt = jax.random.split(key)
    pred = jax.random.normal(k_pred, (n, c), dtype=jnp.float32) * 2.0
    target = jax.random.randint(k_tgt, (n,), 0, c, dtype=jnp.int32)

    # tile_rows=128 -> 3 grid steps with a ragged (masked) last tile.
    loss = label_smoothing_loss(pred, target, smoothing=smoothing, tile_rows=128)
    loss = jax.block_until_ready(loss)

    # Pure-JAX reference matching the PyTorch forward exactly.
    log_prob = jax.nn.log_softmax(pred, axis=-1)
    true_dist = jnp.full((n, c), smoothing / (c - 1), dtype=jnp.float32)
    true_dist = true_dist.at[jnp.arange(n), target].set(1.0 - smoothing)
    ref = jnp.mean(jnp.sum(-true_dist * log_prob, axis=-1))

    assert loss.shape == ()
    assert loss.dtype == jnp.float32
    assert jnp.allclose(loss, ref, atol=1e-4, rtol=1e-4), (loss, ref)

    print("KERNEL_OK")
</pallas_src>

<mosaic_0001>
module attributes {stable_mosaic.version = 11 : i64} {
  func.func @_label_smoothing_loss_kernel(%arg0: i32, %arg1: memref<128x512xf32, #tpu.memory_space<vmem>>, %arg2: memref<128x1xi32, #tpu.memory_space<vmem>>, %arg3: memref<1x1xf32, #tpu.memory_space<vmem>>) attributes {dimension_semantics = [#tpu.dimension_semantics<arbitrary>], iteration_bounds = array<i64: 3>, scalar_prefetch = 0 : i64, scratch_operands = 0 : i64, tpu.core_type = #tpu.core_type<tc>, window_params = [{transform_indices = @transform_0, window_bounds = array<i64: 128, 512>}, {transform_indices = @transform_1, window_bounds = array<i64: 128, 1>}, {pipeline_mode = #tpu.pipeline_mode<synchronous>, transform_indices = @transform_2, window_bounds = array<i64: 1, 1>}]} {
    %c0_i32 = arith.constant 0 : i32
    %0 = arith.cmpi eq, %arg0, %c0_i32 : i32
    %1 = arith.extui %0 : i1 to i32
    %c0_i32_0 = arith.constant 0 : i32
    %2 = arith.cmpi ne, %1, %c0_i32_0 : i32
    scf.if %2 {
      %cst_19 = arith.constant 0.000000e+00 : f32
      %51 = vector.broadcast %cst_19 : f32 to vector<1x1xf32>
      %c0_20 = arith.constant 0 : index
      %c0_21 = arith.constant 0 : index
      %52 = vector.load %arg3[%c0_20, %c0_21] : memref<1x1xf32, #tpu.memory_space<vmem>>, vector<1x1xf32>
      tpu.vector_store %arg3[%c0_20, %c0_21], %51 {strides = array<i32>} : memref<1x1xf32, #tpu.memory_space<vmem>>, vector<1x1xf32>,
    } else {
    }
    %c0 = arith.constant 0 : index
    %c0_1 = arith.constant 0 : index
    %3 = vector.load %arg1[%c0, %c0_1] : memref<128x512xf32, #tpu.memory_space<vmem>>, vector<128x512xf32>
    %c0_2 = arith.constant 0 : index
    %c0_3 = arith.constant 0 : index
    %4 = vector.load %arg2[%c0_2, %c0_3] : memref<128x1xi32, #tpu.memory_space<vmem>>, vector<128x1xi32>
    %cst = arith.constant dense<0xFF800000> : vector<128xf32>
    %5 = vector.multi_reduction <maximumf>, %3, %cst [1] : vector<128x512xf32> to vector<128xf32>
    %6 = vector.shape_cast %5 : vector<128xf32> to vector<128x1xf32>
    %7 = vector.broadcast %6 : vector<128x1xf32> to vector<128x512xf32>
    %8 = arith.subf %3, %7 : vector<128x512xf32>
    %9 = math.exp %8 : vector<128x512xf32>
    %cst_4 = arith.constant dense<0.000000e+00> : vector<128xf32>
    %10 = vector.multi_reduction <add>, %9, %cst_4 [1] : vector<128x512xf32> to vector<128xf32>
    %11 = vector.shape_cast %10 : vector<128xf32> to vector<128x1xf32>
    %12 = math.log %11 : vector<128x1xf32>
    %13 = arith.addf %6, %12 : vector<128x1xf32>
    %cst_5 = arith.constant dense<0.000000e+00> : vector<128xf32>
    %14 = vector.multi_reduction <add>, %3, %cst_5 [1] : vector<128x512xf32> to vector<128xf32>
    %15 = vector.shape_cast %14 : vector<128xf32> to vector<128x1xf32>
    %cst_6 = arith.constant 5.120000e+02 : f32
    %16 = vector.broadcast %cst_6 : f32 to vector<128x1xf32>
    %17 = arith.mulf %16, %13 : vector<128x1xf32>
    %18 = arith.subf %15, %17 : vector<128x1xf32>
    %19 = tpu.iota {dimensions = array<i32: 1>} : vector<128x512xi32>
    %20 = vector.broadcast %4 : vector<128x1xi32> to vector<128x512xi32>
    %21 = arith.cmpi eq, %19, %20 : vector<128x512xi32>
    %cst_7 = arith.constant 0.000000e+00 : f32
    %22 = vector.broadcast %cst_7 : f32 to vector<128x512xf32>
    %23 = arith.select %21, %3, %22 : vector<128x512xi1>, vector<128x512xf32>
    %cst_8 = arith.constant dense<0.000000e+00> : vector<128xf32>
    %24 = vector.multi_reduction <add>, %23, %cst_8 [1] : vector<128x512xf32> to vector<128xf32>
    %25 = vector.shape_cast %24 : vector<128xf32> to vector<128x1xf32>
    %26 = arith.subf %25, %13 : vector<128x1xf32>
    %27 = arith.subf %18, %26 : vector<128x1xf32>
    %cst_9 = arith.constant 1.95694724E-4 : f32
    %28 = vector.broadcast %cst_9 : f32 to vector<128x1xf32>
    %29 = arith.mulf %28, %27 : vector<128x1xf32>
    %cst_10 = arith.constant 0.899999976 : f32
    %30 = vector.broadcast %cst_10 : f32 to vector<128x1xf32>
    %31 = arith.mulf %30, %26 : vector<128x1xf32>
    %32 = arith.addf %29, %31 : vector<128x1xf32>
    %cst_11 = arith.constant 0.000000e+00 : f32
    %33 = vector.broadcast %cst_11 : f32 to vector<128x1xf32>
    %34 = arith.subf %33, %32 : vector<128x1xf32>
    %35 = tpu.iota {dimensions = array<i32: 0>} : vector<128x1xi32>
    %c128_i32 = arith.constant 128 : i32
    %36 = arith.muli %arg0, %c128_i32 : i32
    %37 = vector.broadcast %36 : i32 to vector<128x1xi32>
    %38 = arith.addi %35, %37 : vector<128x1xi32>
    %c300_i32 = arith.constant 300 : i32
    %39 = vector.broadcast %c300_i32 : i32 to vector<128x1xi32>
    %40 = arith.cmpi slt, %38, %39 : vector<128x1xi32>
    %cst_12 = arith.constant 0.000000e+00 : f32
    %41 = vector.broadcast %cst_12 : f32 to vector<128x1xf32>
    %42 = arith.select %40, %34, %41 : vector<128x1xi1>, vector<128x1xf32>
    %c0_13 = arith.constant 0 : index
    %c0_14 = arith.constant 0 : index
    %43 = vector.load %arg3[%c0_13, %c0_14] : memref<1x1xf32, #tpu.memory_space<vmem>>, vector<1x1xf32>
    %cst_15 = arith.constant dense<0.000000e+00> : vector<1xf32>
    %44 = vector.multi_reduction <add>, %42, %cst_15 [0] : vector<128x1xf32> to vector<1xf32>
    %45 = vector.shape_cast %44 : vector<1xf32> to vector<1x1xf32>
    %46 = arith.addf %43, %45 : vector<1x1xf32>
    %c0_16 = arith.constant 0 : index
    %c0_17 = arith.constant 0 : index
    %47 = vector.load %arg3[%c0_16, %c0_17] : memref<1x1xf32, #tpu.memory_space<vmem>>, vector<1x1xf32>
    tpu.vector_store %arg3[%c0_16, %c0_17], %46 {strides = array<i32>} : memref<1x1xf32, #tpu.memory_space<vmem>>, vector<1x1xf32>,
    %c2_i32 = arith.constant 2 : i32
    %48 = arith.cmpi eq, %arg0, %c2_i32 : i32
    %49 = arith.extui %48 : i1 to i32
    %c0_i32_18 = arith.constant 0 : i32
    %50 = arith.cmpi ne, %49, %c0_i32_18 : i32
    scf.if %50 {
      %c0_19 = arith.constant 0 : index
      %c0_20 = arith.constant 0 : index
      %51 = vector.load %arg3[%c0_19, %c0_20] : memref<1x1xf32, #tpu.memory_space<vmem>>, vector<1x1xf32>
      %cst_21 = arith.constant 3.000000e+02 : f32
      %52 = vector.broadcast %cst_21 : f32 to vector<1x1xf32>
      %53 = arith.divf %51, %52 : vector<1x1xf32>
      %c0_22 = arith.constant 0 : index
      %c0_23 = arith.constant 0 : index
      %54 = vector.load %arg3[%c0_22, %c0_23] : memref<1x1xf32, #tpu.memory_space<vmem>>, vector<1x1xf32>
      tpu.vector_store %arg3[%c0_22, %c0_23], %53 {strides = array<i32>} : memref<1x1xf32, #tpu.memory_space<vmem>>, vector<1x1xf32>,
    } else {
    }
    return
  }
  func.func @transform_0(%arg0: i32) -> (i32, i32) {
    %c0_i32 = arith.constant 0 : i32
    %c0_i32_0 = arith.constant 0 : i32
    return %arg0, %c0_i32 : i32, i32
  }
  func.func @transform_1(%arg0: i32) -> (i32, i32) {
    %c0_i32 = arith.constant 0 : i32
    %c0_i32_0 = arith.constant 0 : i32
    return %arg0, %c0_i32 : i32, i32
  }
  func.func @transform_2(%arg0: i32) -> (i32, i32) {
    %c0_i32 = arith.constant 0 : i32
    %c0_i32_0 = arith.constant 0 : i32
    %c0_i32_1 = arith.constant 0 : i32
    return %c0_i32, %c0_i32_0 : i32, i32
  }
}

</mosaic_0001>

<bundles_post_ra>
// kernel: tpu_custom_call.1
= control target key start
LH: loop header
LB: loop body
LE: loop exit
PB: predicated region body
PF: predicated region fallthrough
CT: control target
= control target key end

     0   :  { %7 = vsyncpa [#allocation3], 0  ;;  %s3188_s0 = inlined_call_operand.hbm [shape: f32[384,512], index: 0, kind: input, shape index: {}]   ;;  %s3189_s1 = inlined_call_operand.vmem [shape: s32[384,1], index: 1, kind: input, shape index: {}]   ;;  %s3190_s2 = inlined_call_operand.hbm [shape: f32[1,1], index: 2, kind: output, shape index: {}]  }
   0x1   :  { %9 = vsyncpa [#allocation3 + $0x1], 0 }
   0x2   :  { %10 = vsyncpa [#allocation4], 0  ;;  %s1687_s9 = smov 0   ;;  %s1689_s10 = smov 0  }
   0x3   :  { %s1691_s11 = smov 0   ;;  %s1693_s12 = smov 0  }
   0x4 LB: > { %s1706_s13 = sadd.s32 4294967295, %s1664_s12   ;;  %s1709_s14 = sadd.s32 1, %s1664_s12   ;;  %s1664_s12 = sphi %s1693_s12, %s3393_s12   ;;  %s1660_s11 = sphi %s1691_s11, %s3392_s11   ;;  %s1656_s10 = sphi %s1689_s10, %s3391_s10   ;;  %s1652_s9 = sphi %s1687_s9, %s3390_s9  }
   0x5   : > { %s20_s15 = ssub.s32 %s1664_s12, %s1709_s14  ;;  %s23_s16 = sadd.s32 1, %s1660_s11 }
   0x6   : > { %p21_p0 = scmp.eq.s32.totalorder %s20_s15, 0  ;;  %p30_p1 = scmp.ne.s32.totalorder %s1660_s11, %s1656_s10 }
   0x7   : > { %p31_p2 = scmp.eq.s32.totalorder %s1664_s12, 0  ;;  %p36_p3 = scmp.ne.s32.totalorder %s1656_s10, %s1652_s9 }
   0x8   : > { %s1719_s17 = scalar_select %p21_p0, %s1660_s11, %s23_s16  }
   0x9   : > { %p32_p4 = por %p31_p2, %p30_p1  ;;  %p37_p5 = scmp.eq.s32.totalorder %s1706_s13, 0 }
   0xa   : > { %p1328_p6 = scmp.lt.s32.totalorder %s1664_s12, 3  ;;  %s107_s19 = sand.u32 1, %s1660_s11  }
   0xb   : > { %p1723_p7 = por %p37_p5, %p36_p3  ;;  %s1301_s20 = sshll.u32 %s107_s19, 9 }
   0xc   : > { %s1317_s21 = sshll.u32 %s1664_s12, 13  ;;  %s111_s25 = scalar_lea.vmem [#allocation2], %s1301_s20 }
   0xd   : > { %s1732_s24 = scalar_lea.hbm %s3188_s0, %s1317_s21  ;;  %s119_s26 = sshll.u32 %s111_s25, 4  ;;  %s1734_s26 = int_to_ptr.vmem [resolvable:$true] %s119_s26 }
   0xe   : > { %p1736_p8 = pnand %p1328_p6, %p32_p4  ;;  %s1741_s28 = scalar_lea.sflag [#allocation3], %s107_s19 }
   0xf   : > { %s1570_s29 = scalar_lea.hbm %s1732_s24, 8192  ;;  %s1575_s4 = scalar_lea.hbm %s3188_s0, 24576 }
  0x10   : > { %p1571_p10 = scmp.ne.s32.totalorder %s1732_s24, %s1570_s29  ;;  %p1572_p11 = pneg %p1736_p8 }
  0x11   : > { %p1576_p0 = scmp.lt.u32.totalorder %s1732_s24, %s3188_s0  ;;  %p1577_p1 = scmp.lt.u32.totalorder %s1575_s4, %s1570_s29 }
  0x12   : > { %p1573_p12 = pnand %p1572_p11, %p1571_p10  ;;  %p1579_p3 = scmp.lt.u32.totalorder %s1570_s29, %s1732_s24 }
  0x13   : > { %p1578_p2 = por %p1577_p1, %p1576_p0 }
  0x14   : > { %p1574_p13 = pneg %p1573_p12 }
  0x15   : > { %p1580_p4 = por %p1579_p3, %p1578_p2 }
  0x17   : > { %p1581_p5 = pnand %p1580_p4, %p1574_p13 }
  0x19   : > { %1584 = shalt.err (!%p1581_p5)
}
  0x1a   : > { %s1585_s7 = scalar_lea.vmem %s1734_s26, 8192  ;;  %s1666_s8 = smov [#allocation2]  }
  0x1b   : > { %p1586_p6 = scmp.ne.s32.totalorder %s1734_s26, %s1585_s7  ;;  %s1590_s9 = sshll.u32 %s1666_s8, 4  ;;  %s1591_s9 = int_to_ptr.vmem [resolvable:$false] %s1590_s9 }
  0x1c   : > { %s1592_s15 = scalar_lea.vmem %s1591_s9, 16384  ;;  %p1593_p9 = scmp.lt.s32.totalorder %s1734_s26, %s1591_s9 }
  0x1d   : > { %p1588_p10 = pnand %p1586_p6, %p1572_p11  ;;  %p1594_p0 = scmp.lt.s32.totalorder %s1592_s15, %s1585_s7 }
  0x1f   : > { %p1589_p12 = pneg %p1588_p10  ;;  %p1595_p1 = por %p1594_p0, %p1593_p9 }
  0x21   : > { %p1596_p2 = pnand %p1595_p1, %p1589_p12 }
  0x23   : > { %1599 = shalt.err (!%p1596_p2)
}
  0x24   : > { %s1667_s16 = smov 512   ;;  %s1668_s19 = smov 32  }
  0x25   : > { %1327 = dma.hbm_to_vmem [thread:$0]  (!%p1736_p8), %s1732_s24, 8192, %s1734_s26, %s1741_s28, %s1667_s16, %s1667_s16, %s1668_s19  }
  0x26   : > { %p136_p11 = scmp.lt.s32.totalorder %s1664_s12, 4  ;;  %p3243_p13 = scmp.ge.s32.totalorder %s1664_s12, 1 }
  0x28   : > { %p137_p3 = pnand %p3243_p13, %p136_p11 }
  0x2a   : > { %140 = sbr.rel (%p137_p3) target bundleno = 558 (0x22e), region = 28 }
  0x31   : > { %s142_s20 = sand.u32 1, %s1656_s10  }
  0x32   : > { %s1306_s21 = sshll.u32 %s142_s20, 9  ;;  %s143_s22 = scalar_lea.sflag [#allocation3], %s142_s20 }
  0x33   : > { %s1773_s23 = scalar_lea.vmem [#allocation2], %s1306_s21 }
  0x34   : > { %1643 = dma.done.wait (%p1723_p7), %s143_s22, 8192  }
  0x35   : > { %1645 = vsyncadd (%p1723_p7), %s143_s22, 4294959104  ;;  %s1307_s25 = sshll.u32 %s1706_s13, 4  ;;  %p1309_p8 = scmp.ne.s32.totalorder %s1706_s13, 0 }
  0x36   : > { %p169_p9 = scmp.lt.s32.totalorder %s1307_s25, 47  ;;  %vm178_vm0 = vcmask (!%p1309_p8), 0   ;;  %v1669_v0 = vmov (!%p1309_p8), 0.0  }
  0x37   : > { %177 = sbr.rel (%p1309_p8) target bundleno = 62 (0x3e), region = 36  ;;  %179 = vst.msk [vmem:[#allocation5] sm:$0x1] (!%p1309_p8), %vm178_vm0, %v1669_v0 }
  0x38   : > { %s3395_s25 = smov (!%p169_p9, %s1307_s25), 47 }
  0x39   : > { %s1308_s24 = sshll.u32 %s3395_s25, 3 }
  0x3a   : > { %s1783_s27 = scalar_lea.vmem %s3189_s1, %s1308_s24 }
  0x3e PF: > { %v1787_v1 = vld [vmem:[%s1773_s23 + $0x40] sm:$0xff]  ;;  %v1790_v2 = vld [vmem:[%s1773_s23 + $0x48] sm:$0xff]  ;;  %v1793_v3 = vld [vmem:[%s1773_s23 + $0x50] sm:$0xff]  ;;  %v1670_v7 = vmov 0   ;;  %s1310_s18 = sshll.u32 %s1706_s13, 7  ;;  %p1311_p7 = scmp.ne.s32.totalorder %s1706_s13, 2 }
  0x3f   : > { %3244 = vst [vmem:[#allocation8_spill] sm:$0xff] %v1787_v1  ;;  %3245 = vst [vmem:[#allocation9_spill] sm:$0xff] %v1790_v2  ;;  %v270_v4 = vmax.f32 %v1787_v1, %v1790_v2  ;;  %v1798_v5 = vld [vmem:[%s1773_s23] sm:$0xff]  ;;  %v1801_v6 = vld [vmem:[%s1773_s23 + $0x8] sm:$0xff]  ;;  %1369 = vset.pattern.permute.xlu1 %v1670_v7  ;;  %1368 = vset.pattern.permute.xlu0 %v1670_v7 }
  0x40   : > { %3246 = vst [vmem:[#allocation10_spill] sm:$0xff] %v1793_v3  ;;  %3247 = vst [vmem:[#allocation11_spill] sm:$0xff] %v1798_v5  ;;  %v1804_v8 = vld [vmem:[%s1773_s23 + $0x58] sm:$0xff]  ;;  %v1807_v9 = vld [vmem:[%s1773_s23 + $0x10] sm:$0xff]  ;;  %v260_v10 = vmax.f32 %v1798_v5, %v1801_v6 }
  0x41   : > { %3248 = vst [vmem:[#allocation12_spill] sm:$0xff] %v1801_v6  ;;  %3249 = vst [vmem:[#allocation13_spill] sm:$0xff] %v1804_v8  ;;  %v1812_v11 = vld [vmem:[%s1773_s23 + $0x60] sm:$0xff]  ;;  %v271_v12 = vmax.f32 %v270_v4, %v1793_v3  ;;  %v1816_v13 = vld [vmem:[%s1773_s23 + $0x18] sm:$0xff] }
  0x42   : > { %3250 = vst [vmem:[#allocation14_spill] sm:$0xff] %v1807_v9  ;;  %3251 = vst [vmem:[#allocation15_spill] sm:$0xff] %v1812_v11  ;;  %v1819_v14 = vld [vmem:[%s1773_s23 + $0x68] sm:$0xff]  ;;  %v1822_v15 = vld [vmem:[%s1773_s23 + $0x70] sm:$0xff]  ;;  %v261_v16 = vmax.f32 %v260_v10, %v1807_v9 }
  0x43   : > { %3252 = vst [vmem:[#allocation16_spill] sm:$0xff] %v1816_v13  ;;  %3253 = vst [vmem:[#allocation17_spill] sm:$0xff] %v1819_v14  ;;  %v275_v17 = vmax.f32 %v1812_v11, %v1819_v14  ;;  %v1828_v18 = vld [vmem:[%s1773_s23 + $0x20] sm:$0xff]  ;;  %v1831_v19 = vld [vmem:[%s1773_s23 + $0x28] sm:$0xff]  ;;  %v272_v21 = vmax.f32 %v271_v12, %v1804_v8 }
  0x44   : > { %3254 = vst [vmem:[#allocation18_spill] sm:$0xff] %v1822_v15  ;;  %v1834_v20 = vld [vmem:[%s1773_s23 + $0x30] sm:$0xff]  ;;  %v1838_v22 = vld [vmem:[%s1773_s23 + $0x78] sm:$0xff]  ;;  %v265_v23 = vmax.f32 %v1828_v18, %v1831_v19  ;;  %v1843_v24 = vld [vmem:[%s1773_s23 + $0xa0] sm:$0xff]  ;;  %v262_v26 = vmax.f32 %v261_v16, %v1816_v13 }
  0x45   : > { %3255 = vst [vmem:[#allocation19_spill] sm:$0xff] %v1843_v24  ;;  %v1846_v25 = vld [vmem:[%s1773_s23 + $0xa8] sm:$0xff]  ;;  %v276_v27 = vmax.f32 %v275_v17, %v1822_v15  ;;  %v1851_v28 = vld [vmem:[%s1773_s23 + $0x38] sm:$0xff]  ;;  %v1854_v29 = vld [vmem:[%s1773_s23 + $0xb0] sm:$0xff]  ;;  %273 = vmax.xlane.f32.xlu1 %v272_v21 }
  0x46   : > { %3256 = vst [vmem:[#allocation20_spill] sm:$0xff] %v1854_v29  ;;  %v285_v30 = vmax.f32 %v1843_v24, %v1846_v25  ;;  %v1859_v31 = vld [vmem:[%s1773_s23 + $0x80] sm:$0xff]  ;;  %v266_v32 = vmax.f32 %v265_v23, %v1834_v20  ;;  %v1863_v33 = vld [vmem:[%s1773_s23 + $0xb8] sm:$0xff]  ;;  %v1866_v34 = vld [vmem:[%s1773_s23 + $0x88] sm:$0xff]  ;;  %263 = vmax.xlane.f32.xlu0 %v262_v26 }
  0x47   : > { %3257 = vst [vmem:[#allocation21_spill] sm:$0xff] %v1863_v33  ;;  %v1869_v35 = vld [vmem:[%s1773_s23 + $0x90] sm:$0xff]  ;;  %v277_v36 = vmax.f32 %v276_v27, %v1838_v22  ;;  %v280_v38 = vmax.f32 %v1859_v31, %v1866_v34  ;;  %v1876_v39 = vld [vmem:[%s1773_s23 + $0xe0] sm:$0xff]  ;;  %v1879_v40 = vld [vmem:[%s1773_s23 + $0xe8] sm:$0xff] }
  0x48   : > { %v286_v37 = vmax.f32 %v285_v30, %v1854_v29  ;;  %v1882_v41 = vld [vmem:[%s1773_s23 + $0xf0] sm:$0xff]  ;;  %v267_v42 = vmax.f32 %v266_v32, %v1851_v28  ;;  %v1886_v43 = vld [vmem:[%s1773_s23 + $0x98] sm:$0xff]  ;;  %v295_v44 = vmax.f32 %v1876_v39, %v1879_v40  ;;  %v1891_v45 = vld [vmem:[%s1773_s23 + $0xc0] sm:$0xff] }
  0x49   : > { %v1894_v46 = vld [vmem:[%s1773_s23 + $0xc8] sm:$0xff]  ;;  %v281_v47 = vmax.f32 %v280_v38, %v1869_v35  ;;  %v1898_v48 = vld [vmem:[%s1773_s23 + $0xd0] sm:$0xff]  ;;  %v1903_v50 = vld [vmem:[%s1773_s23 + $0x120] sm:$0xff]  ;;  %278 = vmax.xlane.f32.xlu1 %v277_v36 }
  0x4a   : > { %v290_v49 = vmax.f32 %v1891_v45, %v1894_v46  ;;  %3258 = vst [vmem:[#allocation22_spill] sm:$0xff] %v1903_v50  ;;  %v287_v51 = vmax.f32 %v286_v37, %v1863_v33  ;;  %v1907_v52 = vld [vmem:[%s1773_s23 + $0xf8] sm:$0xff]  ;;  %v296_v53 = vmax.f32 %v295_v44, %v1882_v41  ;;  %v1914_v55 = vld [vmem:[%s1773_s23 + $0x128] sm:$0xff]  ;;  %268 = vmax.xlane.f32.xlu0 %v267_v42  ;;  %v1919_v58 = vld [vmem:[%s1773_s23 + $0x130] sm:$0xff] }
  0x4b   : > { %v1911_v54 = vld [vmem:[%s1773_s23 + $0xd8] sm:$0xff]  ;;  %3259 = vst [vmem:[#allocation23_spill] sm:$0xff] %v1914_v55  ;;  %v282_v56 = vmax.f32 %v281_v47, %v1886_v43  ;;  %v305_v59 = vmax.f32 %v1903_v50, %v1914_v55  ;;  %v1924_v60 = vld [vmem:[%s1773_s23 + $0x100] sm:$0xff]  ;;  %v1927_v61 = vld [vmem:[%s1773_s23 + $0x108] sm:$0xff] }
  0x4c   : > { %v291_v57 = vmax.f32 %v290_v49, %v1898_v48  ;;  %v1930_v62 = vld [vmem:[%s1773_s23 + $0x110] sm:$0xff]  ;;  %v300_v63 = vmax.f32 %v1924_v60, %v1927_v61  ;;  %v1935_v0 = vld [vmem:[%s1773_s23 + $0x160] sm:$0xff]  ;;  %v1938_v4 = vld [vmem:[%s1773_s23 + $0x168] sm:$0xff]  ;;  %v297_v10 = vmax.f32 %v296_v53, %v1907_v52 }
  0x4d   : > { %3260 = vst [vmem:[#allocation24_spill] sm:$0xff] %v1930_v62  ;;  %v1941_v7 = vld [vmem:[%s1773_s23 + $0x140] sm:$0xff]  ;;  %288 = vmax.xlane.f32.xlu1 %v287_v51  ;;  %v1945_v12 = vld [vmem:[%s1773_s23 + $0x138] sm:$0xff]  ;;  %v306_v16 = vmax.f32 %v305_v59, %v1919_v58  ;;  %v315_v21 = vmax.f32 %v1935_v0, %v1938_v4  ;;  %v1954_v23 = vld [vmem:[%s1773_s23 + $0x148] sm:$0xff] }
  0x4e   : > { %3261 = vst [vmem:[#allocation25_spill] sm:$0xff] %v1941_v7  ;;  %v1949_v17 = vld [vmem:[%s1773_s23 + $0x118] sm:$0xff]  ;;  %3262 = vst [vmem:[#allocation26_spill] sm:$0xff] %v1954_v23  ;;  %283 = vmax.xlane.f32.xlu0 %v282_v56  ;;  %v292_v26 = vmax.f32 %v291_v57, %v1911_v54  ;;  %v301_v27 = vmax.f32 %v300_v63, %v1930_v62  ;;  %v1959_v30 = vld [vmem:[%s1773_s23 + $0x170] sm:$0xff]  ;;  %v310_v32 = vmax.f32 %v1941_v7, %v1954_v23 }
  0x4f   : > { %v1964_v36 = vld [vmem:[%s1773_s23 + $0x1a0] sm:$0xff]  ;;  %v1967_v37 = vld [vmem:[%s1773_s23 + $0x1a8] sm:$0xff]  ;;  %v1970_v38 = vld [vmem:[%s1773_s23 + $0x150] sm:$0xff]  ;;  %v307_v47 = vmax.f32 %v306_v16, %v1945_v12  ;;  %v316_v51 = vmax.f32 %v315_v21, %v1959_v30 }
  0x50   : > { %3263 = vst [vmem:[#allocation27_spill] sm:$0xff] %v1964_v36  ;;  %3264 = vst [vmem:[#allocation28_spill] sm:$0xff] %v1967_v37  ;;  %v1973_v42 = vld [vmem:[%s1773_s23 + $0x180] sm:$0xff]  ;;  %v1976_v44 = vld [vmem:[%s1773_s23 + $0x188] sm:$0xff]  ;;  %v325_v56 = vmax.f32 %v1964_v36, %v1967_v37  ;;  %v302_v57 = vmax.f32 %v301_v27, %v1949_v17  ;;  %v311_v59 = vmax.f32 %v310_v32, %v1970_v38 }
  0x51   : > { %3265 = vst [vmem:[#allocation29_spill] sm:$0xff] %v1970_v38  ;;  %3266 = vst [vmem:[#allocation30_spill] sm:$0xff] %v1973_v42  ;;  %298 = vmax.xlane.f32.xlu1 %v297_v10  ;;  %v1980_v49 = vld [vmem:[%s1773_s23 + $0x178] sm:$0xff]  ;;  %v1991_v63 = vld [vmem:[%s1773_s23 + $0x1b0] sm:$0xff]  ;;  %v320_v10 = vmax.f32 %v1973_v42, %v1976_v44 }
  0x52   : > { %3267 = vst [vmem:[#allocation31_spill] sm:$0xff] %v1976_v44  ;;  %v1984_v53 = vld [vmem:[%s1773_s23 + $0x158] sm:$0xff]  ;;  %293 = vmax.xlane.f32.xlu0 %v292_v26  ;;  %v1996_v16 = vld [vmem:[%s1773_s23 + $0x1e0] sm:$0xff]  ;;  %v1999_v21 = vld [vmem:[%s1773_s23 + $0x1e8] sm:$0xff]  ;;  %v317_v27 = vmax.f32 %v316_v51, %v1980_v49  ;;  %v326_v32 = vmax.f32 %v325_v56, %v1991_v63 }
  0x53   : > { %3268 = vst [vmem:[#allocation32_spill] sm:$0xff] %v1996_v16  ;;  %3269 = vst [vmem:[#allocation33_spill] sm:$0xff] %v1999_v21  ;;  %v2002_v23 = vld [vmem:[%s1773_s23 + $0x190] sm:$0xff]  ;;  %v2005_v26 = vld [vmem:[%s1773_s23 + $0x1c0] sm:$0xff]  ;;  %v335_v44 = vmax.f32 %v1996_v16, %v1999_v21  ;;  %v312_v42 = vmax.f32 %v311_v59, %v1984_v53 }
  0x54   : > { %3270 = vst [vmem:[#allocation34_spill] sm:$0xff] %v2005_v26  ;;  %v2008_v37 = vld [vmem:[%s1773_s23 + $0x1c8] sm:$0xff]  ;;  %v2016_v36 = vld [vmem:[%s1773_s23 + $0x1b8] sm:$0xff]  ;;  %v321_v38 = vmax.f32 %v320_v10, %v2002_v23  ;;  %v2020_v7 = vld [vmem:[%s1773_s23 + $0x1f0] sm:$0xff] }
  0x55   : > { %3271 = vst [vmem:[#allocation35_spill] sm:$0xff] %v2008_v37  ;;  %308 = vmax.xlane.f32.xlu1 %v307_v47  ;;  %3272 = vst [vmem:[#allocation36_spill] sm:$0xff] %v2020_v7  ;;  %v330_v47 = vmax.f32 %v2005_v26, %v2008_v37  ;;  %v2025_v51 = vld [vmem:[%s1773_s23 + $0x198] sm:$0xff]  ;;  %v2028_v56 = vld [vmem:[%s1773_s23 + $0x1d0] sm:$0xff]  ;;  %v336_v59 = vmax.f32 %v335_v44, %v2020_v7 }
  0x56   : > { %303 = vmax.xlane.f32.xlu0 %v302_v57  ;;  %3273 = vst [vmem:[#allocation37_spill] sm:$0xff] %v2028_v56  ;;  %v327_v57 = vmax.f32 %v326_v32, %v2016_v36  ;;  %v322_v10 = vmax.f32 %v321_v38, %v2025_v51  ;;  %v2034_v21 = vld [vmem:[%s1773_s23 + $0x1f8] sm:$0xff]  ;;  %v245_v38 = vld [vmem:[%s1783_s27 + $0x8] sm:$0xff]  ;;  %v244_v44 = vld [vmem:[%s1783_s27] sm:$0xff] }
  0x57   : > { %3274 = vst [vmem:[#allocation38_spill] sm:$0xff] %v2034_v21  ;;  %v331_v37 = vmax.f32 %v330_v47, %v2028_v56  ;;  %v2038_v26 = vld [vmem:[%s1773_s23 + $0x1d8] sm:$0xff] }
  0x58   : > { %3275 = vst [vmem:[#allocation39_spill] sm:$0xff] %v2038_v26  ;;  %v247_v47 = vld [vmem:[%s1783_s27 + $0x18] sm:$0xff] }
  0x59   : > { %318 = vmax.xlane.f32.xlu1 %v317_v27  ;;  %v337_v27 = vmax.f32 %v336_v59, %v2034_v21  ;;  %v332_v32 = vmax.f32 %v331_v37, %v2038_v26  ;;  %v248_v59 = vld [vmem:[%s1783_s27 + $0x20] sm:$0xff]  ;;  %v255_v37 = vld [vmem:[%s1783_s27 + $0x58] sm:$0xff]  ;;  %v3213_v21 = vlaneseq }
  0x5a   : > { %313 = vmax.xlane.f32.xlu0 %v312_v42  ;;  %v246_v42 = vld [vmem:[%s1783_s27 + $0x10] sm:$0xff] }
  0x5d   : > { %328 = vmax.xlane.f32.xlu1 %v327_v57  ;;  %v253_v57 = vld [vmem:[%s1783_s27 + $0x48] sm:$0xff] }
  0x5e   : > { %323 = vmax.xlane.f32.xlu0 %v322_v10  ;;  %v249_v10 = vld [vmem:[%s1783_s27 + $0x28] sm:$0xff] }
  0x61   : > { %338 = vmax.xlane.f32.xlu1 %v337_v27  ;;  %v257_v27 = vld [vmem:[%s1783_s27 + $0x68] sm:$0xff] }
  0x62   : > { %333 = vmax.xlane.f32.xlu0 %v332_v32  ;;  %v250_v32 = vld [vmem:[%s1783_s27 + $0x30] sm:$0xff] }
  0x72   : > { %781 = vperm.xlu1 %1369, %v245_v38   ;;  %v259_v38 = vld [vmem:[%s1783_s27 + $0x78] sm:$0xff] }
  0x76   : > { %784 = vperm.xlu1 %1369, %v246_v42   ;;  %v251_v42 = vld [vmem:[%s1783_s27 + $0x38] sm:$0xff] }
  0x78   : > { %778 = vperm.xlu0 %1368, %v244_v44   ;;  %v252_v44 = vld [vmem:[%s1783_s27 + $0x40] sm:$0xff] }
  0x7a   : > { %787 = vperm.xlu1 %1369, %v247_v47   ;;  %v254_v47 = vld [vmem:[%s1783_s27 + $0x50] sm:$0xff] }
  0x7c   : > { %805 = vperm.xlu0 %1368, %v253_v57   ;;  %v256_v57 = vld [vmem:[%s1783_s27 + $0x60] sm:$0xff] }
  0x7e   : > { %790 = vperm.xlu1 %1369, %v248_v59   ;;  %v258_v59 = vld [vmem:[%s1783_s27 + $0x70] sm:$0xff] }
  0x80   : > { %811 = vperm.xlu0 %1368, %v255_v37   ;;  %v660_v37 = vadd.f32 %v1801_v6, %v1798_v5 }
  0x82   : > { %793 = vperm.xlu1 %1369, %v249_v10   ;;  %v661_v10 = vadd.f32 %v660_v37, %v1807_v9 }
  0x84   : > { %817 = vperm.xlu0 %1368, %v257_v27   ;;  %v675_v27 = vadd.f32 %v1819_v14, %v1812_v11 }
  0x86   : > { %796 = vperm.xlu1 %1369, %v250_v32   ;;  %v662_v32 = vadd.f32 %v661_v10, %v1816_v13  ;;  %v670_v10 = vadd.f32 %v1790_v2, %v1787_v1 }
  0x88   : > { %823 = vperm.xlu0 %1368, %v259_v38   ;;  %v676_v38 = vadd.f32 %v675_v27, %v1822_v15 }
  0x8a   : > { %799 = vperm.xlu1 %1369, %v251_v42   ;;  %v685_v42 = vadd.f32 %v1846_v25, %v1843_v24 }
  0x8e   : > { %802 = vperm.xlu1 %1369, %v252_v44   ;;  %v677_v44 = vadd.f32 %v676_v38, %v1838_v22  ;;  %v680_v38 = vadd.f32 %v1866_v34, %v1859_v31 }
  0x92   : > { %808 = vperm.xlu1 %1369, %v254_v47   ;;  %v686_v47 = vadd.f32 %v685_v42, %v1854_v29 }
  0x96   : > { %814 = vperm.xlu1 %1369, %v256_v57   ;;  %v687_v57 = vadd.f32 %v686_v47, %v1863_v33 }
  0x9a   : > { %820 = vperm.xlu1 %1369, %v258_v59   ;;  %v665_v59 = vadd.f32 %v1831_v19, %v1828_v18 }
  0x9c   : > { %v666_v37 = vadd.f32 %v665_v59, %v1834_v20 }
  0x9e   : > { %v667_v27 = vadd.f32 %v666_v37, %v1851_v28 }
  0xa7   : > { %663 = vadd.xlane.f32.xlu0 %v662_v32  ;;  %v671_v32 = vadd.f32 %v670_v10, %v1793_v3 }
  0xa9   : > { %v672_v42 = vadd.f32 %v671_v32, %v1804_v8 }
  0xab   : > { %678 = vadd.xlane.f32.xlu0 %v677_v44  ;;  %v681_v44 = vadd.f32 %v680_v38, %v1869_v35  ;;  %v690_v38 = vadd.f32 %v1894_v46, %v1891_v45 }
  0xad   : > { %v682_v47 = vadd.f32 %v681_v44, %v1886_v43 }
  0xaf   : > { %688 = vadd.xlane.f32.xlu0 %v687_v57 }
  0xbe   : > { %668 = vadd.xlane.f32.xlu1 %v667_v27 }
  0xc2   : > { %673 = vadd.xlane.f32.xlu1 %v672_v42 }
  0xc6   : > { %683 = vadd.xlane.f32.xlu1 %v682_v47  ;;  %v2101_v47 = vand.u32 127, %v3213_v21 }
  0xd2   : > { %v2082_v57 = vpop.xlane.xlu1 %273 }
  0xd3   : > { %3276 = vst [vmem:[#allocation40_spill] sm:$0xff] %v2082_v57  ;;  %v2084_v59 = vpop.xlane.xlu0 %263  ;;  %v348_v37 = vsub.f32 %v1787_v1, %v2082_v57  ;;  %v349_v10 = vsub.f32 %v1790_v2, %v2082_v57  ;;  %v350_v27 = vsub.f32 %v1793_v3, %v2082_v57  ;;  %v351_v42 = vsub.f32 %v1804_v8, %v2082_v57 }
  0xd4   : > { %3277 = vst [vmem:[#allocation41_spill] sm:$0xff] %v2084_v59  ;;  %v340_v2 = vsub.f32 %v1798_v5, %v2084_v59  ;;  %v341_v3 = vsub.f32 %v1801_v6, %v2084_v59  ;;  %v342_v7 = vsub.f32 %v1807_v9, %v2084_v59  ;;  %v691_v57 = vadd.f32 %v690_v38, %v1898_v48 }
  0xd5   : > { %v420_v1 = vmul.f32 1.442695, %v348_v37  ;;  %v422_v26 = vmul.f32 1.442695, %v349_v10  ;;  %v424_v56 = vmul.f32 1.442695, %v350_v27  ;;  %v343_v21 = vsub.f32 %v1816_v13, %v2084_v59 }
  0xd6   : > { %v2092_v32 = vpop.xlane.xlu1 %278  ;;  %v426_v8 = vmul.f32 1.442695, %v351_v42  ;;  %v2115_v37 = vadd.s32 128, %v2101_v47  ;;  %v695_v10 = vadd.f32 %v1879_v40, %v1876_v39  ;;  %v404_v6 = vmul.f32 1.442695, %v340_v2 }
  0xd7   : > { %3278 = vst [vmem:[#allocation42_spill] sm:$0xff] %v2092_v32  ;;  %v2098_v44 = vpop.xlane.xlu0 %268  ;;  %1370 = vpow2.f32 %v420_v1  ;;  %v352_v27 = vsub.f32 %v1812_v11, %v2092_v32  ;;  %v2122_v9 = vadd.s32 256, %v2101_v47  ;;  %v406_v38 = vmul.f32 1.442695, %v341_v3 }
  0xd8   : > { %3279 = vst [vmem:[#allocation43_spill] sm:$0xff] %v2098_v44  ;;  %1372 = vpow2.f32 %v422_v26  ;;  %v353_v42 = vsub.f32 %v1819_v14, %v2092_v32  ;;  %v2129_v13 = vadd.s32 384, %v2101_v47  ;;  %v408_v5 = vmul.f32 1.442695, %v342_v7 }
  0xd9   : > { %1374 = vpow2.f32 %v424_v56  ;;  %v354_v1 = vsub.f32 %v1822_v15, %v2092_v32  ;;  %v2136_v11 = vadd.f32 %v691_v57, %v1911_v54  ;;  %v410_v3 = vmul.f32 1.442695, %v343_v21 }
  0xda   : > { %v2109_v16 = vpop.xlane.xlu1 %288  ;;  %3282 = vst [vmem:[#allocation46_spill] sm:$0xff] %v2129_v13  ;;  %1376 = vpow2.f32 %v426_v8  ;;  %v355_v26 = vsub.f32 %v1838_v22, %v2092_v32  ;;  %v2141_v14 = vadd.f32 %v695_v10, %v1882_v41  ;;  %v428_v13 = vmul.f32 1.442695, %v352_v27 }
  0xdb   : > { %3280 = vst [vmem:[#allocation44_spill] sm:$0xff] %v2109_v16  ;;  %v2126_v59 = vpop.xlane.xlu0 %283  ;;  %3284 = vst [vmem:[#allocation48_spill] sm:$0xff] %v2136_v11  ;;  %1378 = vpow2.f32 %v404_v6  ;;  %v344_v7 = vsub.f32 %v1828_v18, %v2098_v44  ;;  %v345_v56 = vsub.f32 %v1831_v19, %v2098_v44  ;;  %v430_v15 = vmul.f32 1.442695, %v353_v42 }
  0xdc   : > { %3281 = vst [vmem:[#allocation45_spill] sm:$0xff] %v2126_v59  ;;  %3285 = vst [vmem:[#allocation49_spill] sm:$0xff] %v2141_v14  ;;  %1380 = vpow2.f32 %v406_v38  ;;  %v346_v8 = vsub.f32 %v1834_v20, %v2098_v44  ;;  %v347_v21 = vsub.f32 %v1851_v28, %v2098_v44  ;;  %v432_v57 = vmul.f32 1.442695, %v354_v1 }
  0xdd   : > { %1382 = vpow2.f32 %v408_v5  ;;  %v360_v6 = vsub.f32 %v1843_v24, %v2109_v16  ;;  %v2157_v27 = vadd.f32 %v1927_v61, %v1924_v60  ;;  %v434_v38 = vmul.f32 1.442695, %v355_v26 }
  0xde   : > { %v2133_v2 = vpop.xlane.xlu1 %298  ;;  %1384 = vpow2.f32 %v410_v3  ;;  %v361_v42 = vsub.f32 %v1846_v25, %v2109_v16  ;;  %v362_v32 = vsub.f32 %v1854_v29, %v2109_v16  ;;  %v412_v5 = vmul.f32 1.442695, %v344_v7 }
  0xdf   : > { %3283 = vst [vmem:[#allocation47_spill] sm:$0xff] %v2133_v2  ;;  %3287 = vst [vmem:[#allocation51_spill] sm:$0xff] %v2157_v27  ;;  %v2163_v44 = vpop.xlane.xlu0 %293  ;;  %1386 = vpow2.f32 %v428_v13  ;;  %v414_v1 = vmul.f32 1.442695, %v345_v56  ;;  %v363_v11 = vsub.f32 %v1863_v33, %v2109_v16  ;;  %v416_v14 = vmul.f32 1.442695, %v346_v8 }
  0xe0   : > { %3288 = vst [vmem:[#allocation52_spill] sm:$0xff] %v2163_v44  ;;  %1388 = vpow2.f32 %v430_v15  ;;  %v418_v24 = vmul.f32 1.442695, %v347_v21  ;;  %v356_v3 = vsub.f32 %v1859_v31, %v2126_v59  ;;  %v444_v27 = vmul.f32 1.442695, %v360_v6 }
  0xe1   : > { %v2169_v26 = vpop.eup %1370  ;;  %1390 = vpow2.f32 %v432_v57  ;;  %v357_v29 = vsub.f32 %v1866_v34, %v2126_v59  ;;  %v358_v13 = vsub.f32 %v1869_v35, %v2126_v59  ;;  %v446_v15 = vmul.f32 1.442695, %v361_v42 }
  0xe2   : > { %v2153_v10 = vpop.xlane.xlu1 %308  ;;  %3289 = vst [vmem:[#allocation53_spill] sm:$0xff] %v2169_v26  ;;  %v2177_v56 = vpop.eup %1372  ;;  %1392 = vpow2.f32 %v434_v38  ;;  %v448_v8 = vmul.f32 1.442695, %v362_v32  ;;  %v359_v21 = vsub.f32 %v1886_v43, %v2126_v59  ;;  %v450_v57 = vmul.f32 1.442695, %v363_v11 }
  0xe3   : > { %3286 = vst [vmem:[#allocation50_spill] sm:$0xff] %v2153_v10  ;;  %3291 = vst [vmem:[#allocation55_spill] sm:$0xff] %v2177_v56  ;;  %v2181_v16 = vpop.eup %1374  ;;  %1394 = vpow2.f32 %v412_v5  ;;  %v368_v6 = vsub.f32 %v1876_v39, %v2133_v2  ;;  %v369_v33 = vsub.f32 %v1879_v40, %v2133_v2  ;;  %v436_v56 = vmul.f32 1.442695, %v356_v3  ;;  %v2193_v42 = vpop.xlane.xlu0 %303 }
  0xe4   : > { %3292 = vst [vmem:[#allocation56_spill] sm:$0xff] %v2181_v16  ;;  %v2187_v26 = vpop.eup %1376  ;;  %1396 = vpow2.f32 %v414_v1  ;;  %v370_v32 = vsub.f32 %v1882_v41, %v2133_v2  ;;  %v371_v38 = vsub.f32 %v1907_v52, %v2133_v2  ;;  %3294 = vst [vmem:[#allocation58_spill] sm:$0xff] %v2193_v42  ;;  %v438_v11 = vmul.f32 1.442695, %v357_v29 }
  0xe5   : > { %3293 = vst [vmem:[#allocation57_spill] sm:$0xff] %v2187_v26  ;;  %v2195_v5 = vpop.eup %1378  ;;  %1398 = vpow2.f32 %v416_v14  ;;  %v440_v39 = vmul.f32 1.442695, %v358_v13  ;;  %v364_v40 = vsub.f32 %v1891_v45, %v2163_v44  ;;  %v442_v3 = vmul.f32 1.442695, %v359_v21 }
  0xe6   : > { %v2175_v7 = vpop.xlane.xlu1 %318  ;;  %v2201_v1 = vpop.eup %1380  ;;  %1400 = vpow2.f32 %v418_v24  ;;  %v365_v41 = vsub.f32 %v1894_v46, %v2163_v44  ;;  %v366_v2 = vsub.f32 %v1898_v48, %v2163_v44  ;;  %v460_v14 = vmul.f32 1.442695, %v368_v6 }
  0xe7   : > { %3290 = vst [vmem:[#allocation54_spill] sm:$0xff] %v2175_v7  ;;  %v2207_v26 = vpop.eup %1382  ;;  %1402 = vpow2.f32 %v444_v27  ;;  %v462_v29 = vmul.f32 1.442695, %v369_v33  ;;  %v367_v45 = vsub.f32 %v1911_v54, %v2163_v44  ;;  %v464_v16 = vmul.f32 1.442695, %v370_v32  ;;  %v2227_v44 = vpop.xlane.xlu0 %313 }
  0xe8   : > { %v2211_v13 = vpop.eup %1384  ;;  %1404 = vpow2.f32 %v446_v15  ;;  %v466_v24 = vmul.f32 1.442695, %v371_v38  ;;  %v376_v21 = vsub.f32 %v1903_v50, %v2153_v10  ;;  %v452_v48 = vmul.f32 1.442695, %v364_v40  ;;  %3297 = vst [vmem:[#allocation61_spill] sm:$0xff] %v2227_v44 }
  0xe9   : > { %3296 = vst [vmem:[#allocation60_spill] sm:$0xff] %v2211_v13  ;;  %v2215_v46 = vpop.eup %1386  ;;  %1406 = vpow2.f32 %v448_v8  ;;  %v377_v27 = vsub.f32 %v1914_v55, %v2153_v10  ;;  %v378_v33 = vsub.f32 %v1919_v58, %v2153_v10  ;;  %v454_v15 = vmul.f32 1.442695, %v365_v41 }
  0xea   : > { %v2199_v59 = vpop.xlane.xlu1 %328  ;;  %v2223_v54 = vpop.eup %1388  ;;  %1408 = vpow2.f32 %v450_v57  ;;  %v456_v32 = vmul.f32 1.442695, %v366_v2  ;;  %v379_v38 = vsub.f32 %v1945_v12, %v2153_v10  ;;  %v458_v40 = vmul.f32 1.442695, %v367_v45 }
  0xeb   : > { %3295 = vst [vmem:[#allocation59_spill] sm:$0xff] %v2199_v59  ;;  %v2229_v8 = vpop.eup %1390  ;;  %1410 = vpow2.f32 %v436_v56  ;;  %v372_v13 = vsub.f32 %v1924_v60, %v2193_v42  ;;  %v373_v58 = vsub.f32 %v1927_v61, %v2193_v42  ;;  %v476_v57 = vmul.f32 1.442695, %v376_v21 }
  0xec   : > { %3298 = vst [vmem:[#allocation62_spill] sm:$0xff] %v2229_v8  ;;  %v2235_v55 = vpop.eup %1392  ;;  %1412 = vpow2.f32 %v438_v11  ;;  %v374_v2 = vsub.f32 %v1930_v62, %v2193_v42  ;;  %v375_v12 = vsub.f32 %v1949_v17, %v2193_v42  ;;  %v478_v56 = vmul.f32 1.442695, %v377_v27  ;;  %v3308_v8 = vld [vmem:[#allocation28_spill] sm:$0xff] }
  0xed   : > { %3299 = vst [vmem:[#allocation63_spill] sm:$0xff] %v2235_v55  ;;  %v2241_v41 = vpop.eup %1394  ;;  %1414 = vpow2.f32 %v440_v39  ;;  %v480_v45 = vmul.f32 1.442695, %v378_v33  ;;  %v384_v60 = vsub.f32 %v1935_v0, %v2175_v7  ;;  %v482_v11 = vmul.f32 1.442695, %v379_v38  ;;  %v2269_v55 = vpop.xlane.xlu0 %323 }
  0xee   : > { %v2221_v6 = vpop.xlane.xlu1 %338  ;;  %v2247_v61 = vpop.eup %1396  ;;  %1416 = vpow2.f32 %v442_v3  ;;  %v385_v21 = vsub.f32 %v1938_v4, %v2175_v7  ;;  %v386_v17 = vsub.f32 %v1959_v30, %v2175_v7  ;;  %v2255_v39 = vmul.f32 1.442695, %v372_v13  ;;  %v3300_v4 = vld [vmem:[#allocation25_spill] sm:$0xff] }
  0xef   : > { %v2253_v42 = vpop.eup %1398  ;;  %1418 = vpow2.f32 %v460_v14  ;;  %v2257_v27 = vmul.f32 1.442695, %v373_v58  ;;  %v387_v0 = vsub.f32 %v1980_v49, %v2175_v7  ;;  %v2263_v3 = vmul.f32 1.442695, %v374_v2  ;;  %3301 = vst [vmem:[#allocation25_spill] sm:$0xff] %v2269_v55  ;;  %v3303_v58 = vld [vmem:[#allocation26_spill] sm:$0xff] }
  0xf0   : > { %v2261_v33 = vpop.eup %1400  ;;  %1420 = vpow2.f32 %v462_v29  ;;  %v2265_v38 = vmul.f32 1.442695, %v375_v12  ;;  %v380_v30 = vsub.f32 %v3300_v4, %v2227_v44  ;;  %v2273_v13 = vmul.f32 1.442695, %v384_v60  ;;  %v3304_v7 = vld [vmem:[#allocation29_spill] sm:$0xff] }
  0xf1   : > { %v2271_v14 = vpop.eup %1402  ;;  %1422 = vpow2.f32 %v464_v16  ;;  %v381_v49 = vsub.f32 %v3303_v58, %v2227_v44  ;;  %v382_v29 = vsub.f32 %v3304_v7, %v2227_v44  ;;  %v2283_v50 = vmul.f32 1.442695, %v385_v21  ;;  %v3307_v58 = vld [vmem:[#allocation27_spill] sm:$0xff] }
  0xf2   : > { %v2245_v10 = vpop.permute.xlu1 %781  ;;  %3302 = vst [vmem:[#allocation64_spill] sm:$0xff] %v2271_v14  ;;  %v2281_v12 = vpop.eup %1404  ;;  %1424 = vpow2.f32 %v466_v24  ;;  %v2285_v4 = vmul.f32 1.442695, %v386_v17  ;;  %v383_v16 = vsub.f32 %v1984_v53, %v2227_v44  ;;  %v2291_v14 = vmul.f32 1.442695, %v387_v0 }
  0xf3   : > { %3305 = vst [vmem:[#allocation26_spill] sm:$0xff] %v2281_v12  ;;  %v2289_v60 = vpop.eup %1406  ;;  %1426 = vpow2.f32 %v452_v48  ;;  %v392_v7 = vsub.f32 %v3307_v58, %v2199_v59  ;;  %v393_v62 = vsub.f32 %v3308_v8, %v2199_v59  ;;  %v2299_v24 = vmul.f32 1.442695, %v380_v30  ;;  %v3310_v8 = vld [vmem:[#allocation30_spill] sm:$0xff] }
  0xf4   : > { %3306 = vst [vmem:[#allocation29_spill] sm:$0xff] %v2289_v60  ;;  %v2297_v12 = vpop.eup %1408  ;;  %1428 = vpow2.f32 %v454_v15  ;;  %v394_v21 = vsub.f32 %v1991_v63, %v2199_v59  ;;  %v395_v53 = vsub.f32 %v2016_v36, %v2199_v59  ;;  %v2307_v17 = vmul.f32 1.442695, %v381_v49  ;;  %v3312_v63 = vld [vmem:[#allocation31_spill] sm:$0xff]  ;;  %v2323_v49 = vpop.xlane.xlu0 %333 }
  0xf5   : > { %3309 = vst [vmem:[#allocation27_spill] sm:$0xff] %v2297_v12  ;;  %v2305_v48 = vpop.eup %1410  ;;  %1430 = vpow2.f32 %v456_v32  ;;  %v2309_v0 = vmul.f32 1.442695, %v382_v29  ;;  %v388_v58 = vsub.f32 %v3310_v8, %v2269_v55  ;;  %v2317_v30 = vmul.f32 1.442695, %v383_v16 }
  0xf6   : > { %v2279_v2 = vpop.permute.xlu1 %784  ;;  %v2315_v15 = vpop.eup %1412  ;;  %1432 = vpow2.f32 %v458_v40  ;;  %v389_v36 = vsub.f32 %v3312_v63, %v2269_v55  ;;  %v390_v32 = vsub.f32 %v2002_v23, %v2269_v55  ;;  %v2327_v59 = vmul.f32 1.442695, %v392_v7  ;;  %v3315_v23 = vld [vmem:[#allocation32_spill] sm:$0xff]  ;;  %v3318_v7 = vld [vmem:[#allocation33_spill] sm:$0xff] }
  0xf7   : > { %3311 = vst [vmem:[#allocation28_spill] sm:$0xff] %v2315_v15  ;;  %v2325_v29 = vpop.eup %1414  ;;  %1434 = vpow2.f32 %v476_v57  ;;  %v2329_v8 = vmul.f32 1.442695, %v393_v62  ;;  %v391_v40 = vsub.f32 %v2025_v51, %v2269_v55  ;;  %v2335_v12 = vmul.f32 1.442695, %v394_v21 }
  0xf8   : > { %3313 = vst [vmem:[#allocation30_spill] sm:$0xff] %v2325_v29  ;;  %v2333_v16 = vpop.eup %1416  ;;  %1436 = vpow2.f32 %v478_v56  ;;  %v2337_v63 = vmul.f32 1.442695, %v395_v53  ;;  %v400_v60 = vsub.f32 %v3315_v23, %v2221_v6  ;;  %v2343_v57 = vmul.f32 1.442695, %v388_v58  ;;  %v779_v53 = vpop.permute.xlu0 %778  ;;  %v3320_v23 = vld [vmem:[#allocation36_spill] sm:$0xff] }
  0xf9   : > { %3314 = vst [vmem:[#allocation31_spill] sm:$0xff] %v2333_v16  ;;  %v2341_v15 = vpop.eup %1418  ;;  %1438 = vpow2.f32 %v480_v45  ;;  %vm829_vm1 = vcmp.eq.s32.totalorder %v2101_v47, %v2245_v10  ;;  %vm830_vm2 = vcmp.eq.s32.totalorder %v2115_v37, %v2245_v10  ;;  %v2351_v51 = vmul.f32 1.442695, %v389_v36 }
  0xfa   : > { %v2313_v44 = vpop.permute.xlu1 %787  ;;  %3316 = vst [vmem:[#allocation32_spill] sm:$0xff] %v2341_v15  ;;  %v2349_v62 = vpop.eup %1420  ;;  %1440 = vpow2.f32 %v482_v11  ;;  %v2353_v56 = vmul.f32 1.442695, %v390_v32  ;;  %v401_v21 = vsub.f32 %v3318_v7, %v2221_v6  ;;  %v2360_v58 = vmul.f32 1.442695, %v391_v40 }
  0xfb   : > { %3317 = vst [vmem:[#allocation65_spill] sm:$0xff] %v2349_v62  ;;  %v2357_v45 = vpop.eup %1422  ;;  %1442 = vpow2.f32 %v2255_v39  ;;  %vm831_vm3 = vcmp.eq.s32.totalorder %v2122_v9, %v2245_v10  ;;  %v2371_v32 = vmul.f32 1.442695, %v400_v60  ;;  %v893_v39 = vsel %vm829_vm1, %v1828_v18, 0.0  ;;  %v3333_v62 = vld [vmem:[#allocation16_spill] sm:$0xff] }
  0xfc   : > { %3319 = vst [vmem:[#allocation33_spill] sm:$0xff] %v2357_v45  ;;  %v2368_v36 = vpop.eup %1424  ;;  %1444 = vpow2.f32 %v2257_v27  ;;  %v894_v40 = vsel %vm830_vm2, %v1831_v19, 0.0  ;;  %vm825_vm4 = vcmp.eq.s32.totalorder %v2101_v47, %v779_v53  ;;  %vm826_vm5 = vcmp.eq.s32.totalorder %v2115_v37, %v779_v53  ;;  %v3322_v27 = vld [vmem:[#allocation46_spill] sm:$0xff] }
  0xfd   : > { %3321 = vst [vmem:[#allocation36_spill] sm:$0xff] %v2368_v36  ;;  %v2381_v7 = vpop.eup %1426  ;;  %vm832_vm6 = vcmp.eq.s32.totalorder %v3322_v27, %v2245_v10  ;;  %v958_v60 = vadd.f32 %v894_v40, %v893_v39  ;;  %1446 = vpow2.f32 %v2263_v3  ;;  %v2390_v18 = vmul.f32 1.442695, %v401_v21  ;;  %v3324_v36 = vld [vmem:[#allocation34_spill] sm:$0xff]  ;;  %v3327_v39 = vld [vmem:[#allocation11_spill] sm:$0xff]  ;;  %v3328_v40 = vld [vmem:[#allocation12_spill] sm:$0xff] }
  0xfe   : > { %v2366_v11 = vpop.permute.xlu1 %790  ;;  %v2387_v55 = vpop.eup %1428  ;;  %v396_v16 = vsub.f32 %v3324_v36, %v2323_v49  ;;  %v895_v19 = vsel %vm831_vm3, %v1834_v20, 0.0  ;;  %1448 = vpow2.f32 %v2265_v38  ;;  %vm827_vm7 = vcmp.eq.s32.totalorder %v2122_v9, %v779_v53  ;;  %v3329_v10 = vld [vmem:[#allocation14_spill] sm:$0xff] }
  0xff   : > { %3323 = vst [vmem:[#allocation46_spill] sm:$0xff] %v2387_v55  ;;  %v2398_v45 = vpop.eup %1430  ;;  %v959_v29 = vadd.f32 %v958_v60, %v895_v19  ;;  %vm828_vm8 = vcmp.eq.s32.totalorder %v3322_v27, %v779_v53  ;;  %v896_v21 = vsel %vm832_vm6, %v1851_v28, 0.0  ;;  %v889_v36 = vsel %vm825_vm4, %v3327_v39, 0.0  ;;  %v3331_v39 = vld [vmem:[#allocation35_spill] sm:$0xff]  ;;  %v3335_v53 = vld [vmem:[#allocation17_spill] sm:$0xff] }
 0x100   : > { %3325 = vst [vmem:[#allocation34_spill] sm:$0xff] %v2398_v45  ;;  %v2403_v3 = vpop.eup %1432  ;;  %v890_v20 = vsel %vm826_vm5, %v3328_v40, 0.0  ;;  %v891_v45 = vsel %vm827_vm7, %v3329_v10, 0.0  ;;  %vm837_vm9 = vcmp.eq.s32.totalorder %v2101_v47, %v2313_v44  ;;  %vm838_vm10 = vcmp.eq.s32.totalorder %v2115_v37, %v2313_v44  ;;  %v3332_v10 = vld [vmem:[#allocation37_spill] sm:$0xff] }
 0x101   : > { %3326 = vst [vmem:[#allocation66_spill] sm:$0xff] %v2403_v3  ;;  %v2413_v38 = vpop.eup %1434  ;;  %v960_v60 = vadd.f32 %v959_v29, %v896_v21  ;;  %v953_v28 = vadd.f32 %v890_v20, %v889_v36  ;;  %1450 = vpow2.f32 %v2273_v13  ;;  %v397_v40 = vsub.f32 %v3331_v39, %v2323_v49 }
 0x102   : > { %3330 = vst [vmem:[#allocation11_spill] sm:$0xff] %v2413_v38  ;;  %v2419_v19 = vpop.permute.xlu1 %793  ;;  %v2421_v3 = vpop.eup %1436  ;;  %v398_v38 = vsub.f32 %v3332_v10, %v2323_v49  ;;  %v892_v15 = vsel %vm828_vm8, %v3333_v62, 0.0  ;;  %1452 = vpow2.f32 %v2283_v50  ;;  %vm833_vm11 = vcmp.eq.s32.totalorder %v2101_v47, %v2279_v2  ;;  %v3334_v62 = vld [vmem:[#allocation15_spill] sm:$0xff]  ;;  %v3338_v10 = vld [vmem:[#allocation8_spill] sm:$0xff] }
 0x103   : > { %v2431_v55 = vpop.eup %1438  ;;  %vm834_vm12 = vcmp.eq.s32.totalorder %v2115_v37, %v2279_v2  ;;  %961 = vadd.xlane.f32.xlu1 %v960_v60  ;;  %v954_v13 = vadd.f32 %v953_v28, %v891_v45  ;;  %1454 = vpow2.f32 %v2285_v4  ;;  %vm839_vm13 = vcmp.eq.s32.totalorder %v2122_v9, %v2313_v44  ;;  %v3336_v45 = vld [vmem:[#allocation39_spill] sm:$0xff] }
 0x104   : > { %v2438_v29 = vpop.eup %1440  ;;  %v901_v50 = vsel %vm837_vm9, %v3334_v62, 0.0  ;;  %v902_v21 = vsel %vm838_vm10, %v3335_v53, 0.0  ;;  %1456 = vpow2.f32 %v2291_v14  ;;  %v399_v4 = vsub.f32 %v3336_v45, %v2323_v49  ;;  %v3337_v14 = vld [vmem:[#allocation18_spill] sm:$0xff] }
 0x105   : > { %v2451_v36 = vpop.eup %1442  ;;  %vm841_vm14 = vcmp.eq.s32.totalorder %v2101_v47, %v2366_v11  ;;  %v955_v20 = vadd.f32 %v954_v13, %v892_v15  ;;  %1458 = vpow2.f32 %v2299_v24  ;;  %vm840_vm15 = vcmp.eq.s32.totalorder %v3322_v27, %v2313_v44  ;;  %v3339_v13 = vld [vmem:[#allocation9_spill] sm:$0xff] }
 0x106   : > { %v2458_v60 = vpop.eup %1444  ;;  %v968_v28 = vadd.f32 %v902_v21, %v901_v50  ;;  %vm835_vm0 = vcmp.eq.s32.totalorder %v2122_v9, %v2279_v2  ;;  %1460 = vpow2.f32 %v2307_v17  ;;  %v903_v39 = vsel %vm839_vm13, %v3337_v14, 0.0  ;;  %v2475_v62 = vpop.permute.xlu1 %796  ;;  %v3340_v14 = vld [vmem:[#allocation10_spill] sm:$0xff] }
 0x107   : > { %956 = vadd.xlane.f32.xlu0 %v955_v20  ;;  %v897_v15 = vsel %vm833_vm11, %v3338_v10, 0.0  ;;  %v898_v24 = vsel %vm834_vm12, %v3339_v13, 0.0  ;;  %v2477_v50 = vpop.eup %1446  ;;  %1462 = vpow2.f32 %v2309_v0  ;;  %vm836_vm1 = vcmp.eq.s32.totalorder %v3322_v27, %v2279_v2 }
 0x108   : > { %v969_v17 = vadd.f32 %v968_v28, %v903_v39  ;;  %v963_v53 = vadd.f32 %v898_v24, %v897_v15  ;;  %v2482_v21 = vpop.eup %1448  ;;  %1464 = vpow2.f32 %v2317_v30  ;;  %vm842_vm2 = vcmp.eq.s32.totalorder %v2115_v37, %v2366_v11  ;;  %v3341_v30 = vld [vmem:[#allocation13_spill] sm:$0xff] }
 0x109   : > { %v904_v20 = vsel %vm840_vm15, %v1838_v22, 0.0  ;;  %v899_v0 = vsel %vm835_vm0, %v3340_v14, 0.0  ;;  %1466 = vpow2.f32 %v2327_v59  ;;  %v516_v28 = vmul.f32 1.442695, %v396_v16 }
 0x10a   : > { %v970_v39 = vadd.f32 %v969_v17, %v904_v20  ;;  %v964_v10 = vadd.f32 %v963_v53, %v899_v0  ;;  %vm845_vm3 = vcmp.eq.s32.totalorder %v2101_v47, %v2419_v19  ;;  %v900_v15 = vsel %vm836_vm1, %v3341_v30, 0.0  ;;  %v3342_v53 = vld [vmem:[#allocation19_spill] sm:$0xff] }
 0x10b   : > { %vm843_vm4 = vcmp.eq.s32.totalorder %v2122_v9, %v2366_v11  ;;  %v905_v22 = vsel %vm841_vm14, %v1859_v31, 0.0  ;;  %v2505_v44 = vpop.eup %1450  ;;  %1468 = vpow2.f32 %v2329_v8  ;;  %vm846_vm5 = vcmp.eq.s32.totalorder %v2115_v37, %v2419_v19  ;;  %v2519_v8 = vpop.permute.xlu1 %799 }
 0x10c   : > { %971 = vadd.xlane.f32.xlu1 %v970_v39  ;;  %v965_v59 = vadd.f32 %v964_v10, %v900_v15  ;;  %v906_v2 = vsel %vm842_vm2, %v1866_v34, 0.0  ;;  %v2514_v16 = vpop.eup %1452  ;;  %1470 = vpow2.f32 %v2343_v57  ;;  %v518_v13 = vmul.f32 1.442695, %v397_v40  ;;  %v3343_v39 = vld [vmem:[#allocation20_spill] sm:$0xff]  ;;  %v3345_v15 = vld [vmem:[#allocation55_spill] sm:$0xff] }
 0x10d   : > { %vm844_vm6 = vcmp.eq.s32.totalorder %v3322_v27, %v2366_v11  ;;  %v973_v31 = vadd.f32 %v906_v2, %v905_v22  ;;  %v2521_v24 = vpop.eup %1454  ;;  %1472 = vpow2.f32 %v2351_v51  ;;  %v520_v17 = vmul.f32 1.442695, %v398_v38 }
 0x10e   : > { %966 = vadd.xlane.f32.xlu0 %v965_v59  ;;  %v907_v34 = vsel %vm843_vm4, %v1869_v35, 0.0  ;;  %vm847_vm7 = vcmp.eq.s32.totalorder %v2122_v9, %v2419_v19  ;;  %v2530_v57 = vpop.eup %1456  ;;  %1474 = vpow2.f32 %v2335_v12  ;;  %v909_v51 = vsel %vm845_vm3, %v3342_v53, 0.0 }
 0x10f   : > { %v974_v40 = vadd.f32 %v973_v31, %v907_v34  ;;  %v910_v38 = vsel %vm846_vm5, %v1846_v25, 0.0  ;;  %v1459_v20 = vpop.eup %1458  ;;  %1476 = vpow2.f32 %v2353_v56  ;;  %v908_v35 = vsel %vm844_vm6, %v1886_v43, 0.0  ;;  %v3344_v43 = vld [vmem:[#allocation53_spill] sm:$0xff] }
 0x110   : > { %vm848_vm8 = vcmp.eq.s32.totalorder %v3322_v27, %v2419_v19  ;;  %v978_v12 = vadd.f32 %v910_v38, %v909_v51  ;;  %v1461_v14 = vpop.eup %1460  ;;  %1478 = vpow2.f32 %v516_v28  ;;  %v911_v10 = vsel %vm847_vm7, %v3343_v39, 0.0  ;;  %v3346_v28 = vld [vmem:[#allocation21_spill] sm:$0xff] }
 0x111   : > { %v975_v0 = vadd.f32 %v974_v40, %v908_v35  ;;  %v537_v25 = vadd.f32 %v2247_v61, %v2241_v41  ;;  %v2551_v30 = vpop.eup %1462  ;;  %1480 = vpow2.f32 %v518_v13  ;;  %v532_v11 = vadd.f32 %v2201_v1, %v2195_v5  ;;  %v2562_v41 = vpop.permute.xlu1 %802  ;;  %v3347_v31 = vld [vmem:[#allocation49_spill] sm:$0xff]  ;;  %v3348_v40 = vld [vmem:[#allocation56_spill] sm:$0xff]  ;;  %v3353_v35 = vld [vmem:[#allocation51_spill] sm:$0xff] }
 0x112   : > { %v979_v56 = vadd.f32 %v978_v12, %v911_v10  ;;  %v542_v22 = vadd.f32 %v3345_v15, %v3344_v43  ;;  %v2557_v19 = vpop.eup %1464  ;;  %1482 = vpow2.f32 %v2337_v63  ;;  %v912_v59 = vsel %vm848_vm8, %v3346_v28, 0.0  ;;  %v2573_v63 = vpop.permute.xlu0 %805  ;;  %v3355_v10 = vld [vmem:[#allocation22_spill] sm:$0xff]  ;;  %v3358_v43 = vld [vmem:[#allocation64_spill] sm:$0xff] }
 0x113   : > { %976 = vadd.xlane.f32.xlu0 %v975_v0  ;;  %v538_v2 = vadd.f32 %v2253_v42, %v537_v25  ;;  %v547_v61 = vadd.f32 %v2223_v54, %v2215_v46  ;;  %v1467_v13 = vpop.eup %1466  ;;  %1484 = vpow2.f32 %v2360_v58  ;;  %v533_v1 = vadd.f32 %v2207_v26, %v532_v11  ;;  %v3349_v46 = vld [vmem:[#allocation28_spill] sm:$0xff]  ;;  %v3350_v58 = vld [vmem:[#allocation38_spill] sm:$0xff]  ;;  %v3356_v25 = vld [vmem:[#allocation23_spill] sm:$0xff] }
 0x114   : > { %v980_v5 = vadd.f32 %v979_v56, %v912_v59  ;;  %v2570_v34 = vadd.f32 %v3347_v31, %v1907_v52  ;;  %1486 = vpow2.f32 %v2371_v32  ;;  %v543_v53 = vadd.f32 %v3348_v40, %v542_v22  ;;  %v3352_v32 = vld [vmem:[#allocation24_spill] sm:$0xff]  ;;  %v3354_v0 = vld [vmem:[#allocation62_spill] sm:$0xff] }
 0x115   : > { %v539_v42 = vadd.f32 %v2261_v33, %v538_v2  ;;  %v552_v54 = vadd.f32 %v3349_v46, %v2305_v48  ;;  %v1469_v51 = vpop.eup %1468  ;;  %v403_v38 = vsub.f32 %v3350_v58, %v2221_v6  ;;  %v3351_v26 = vsub.f32 %v3320_v23, %v2221_v6  ;;  %v3357_v56 = vld [vmem:[#allocation60_spill] sm:$0xff]  ;;  %v3359_v15 = vld [vmem:[#allocation26_spill] sm:$0xff]  ;;  %v3362_v2 = vld [vmem:[#allocation65_spill] sm:$0xff] }
 0x116   : > { %1488 = vpow2.f32 %v520_v17  ;;  %981 = vadd.xlane.f32.xlu1 %v980_v5  ;;  %v2586_v12 = vadd.f32 %v3353_v35, %v3352_v32  ;;  %v1471_v33 = vpop.eup %1470  ;;  %v522_v48 = vmul.f32 1.442695, %v399_v4  ;;  %v548_v39 = vadd.f32 %v3354_v0, %v547_v61  ;;  %v3360_v28 = vld [vmem:[#allocation46_spill] sm:$0xff]  ;;  %v3361_v59 = vld [vmem:[#allocation32_spill] sm:$0xff]  ;;  %v3363_v5 = vld [vmem:[#allocation57_spill] sm:$0xff]  ;;  %v2605_v61 = vpop.permute.xlu1 %808 }
 0x117   : > { %v528_v52 = vmul.f32 1.442695, %v3351_v26  ;;  %1490 = vpow2.f32 %v2390_v18  ;;  %540 = vadd.xlane.f32.xlu0 %v539_v42  ;;  %v2595_v23 = vadd.f32 %v3356_v25, %v3355_v10  ;;  %v1473_v17 = vpop.eup %1472  ;;  %v534_v11 = vadd.f32 %v3357_v56, %v533_v1  ;;  %v3364_v42 = vld [vmem:[#allocation30_spill] sm:$0xff]  ;;  %v3365_v1 = vld [vmem:[#allocation11_spill] sm:$0xff]  ;;  %v3369_v0 = vld [vmem:[#allocation33_spill] sm:$0xff] }
 0x118   : > { %v557_v22 = vadd.f32 %v3359_v15, %v3358_v43  ;;  %v562_v18 = vadd.f32 %v3360_v28, %v2381_v7  ;;  %v567_v45 = vadd.f32 %v3362_v2, %v3361_v59  ;;  %v1475_v4 = vpop.eup %1474  ;;  %v544_v31 = vadd.f32 %v3363_v5, %v543_v53  ;;  %v3370_v56 = vld [vmem:[#allocation31_spill] sm:$0xff] }
 0x119   : > { %v553_v40 = vadd.f32 %v3364_v42, %v552_v54  ;;  %v572_v46 = vadd.f32 %v2458_v60, %v2451_v36  ;;  %v577_v58 = vadd.f32 %v2421_v3, %v3365_v1  ;;  %v1477_v26 = vpop.eup %1476  ;;  %1492 = vpow2.f32 %v528_v52  ;;  %v2618_v36 = vpop.permute.xlu0 %811  ;;  %v3367_v54 = vld [vmem:[#allocation29_spill] sm:$0xff]  ;;  %v3368_v52 = vld [vmem:[#allocation34_spill] sm:$0xff] }
 0x11a   : > { %v530_v32 = vmul.f32 1.442695, %v403_v38  ;;  %vm849_vm9 = vcmp.eq.s32.totalorder %v2101_v47, %v2475_v62  ;;  %535 = vadd.xlane.f32.xlu1 %v534_v11  ;;  %v582_v7 = vadd.f32 %v1461_v14, %v1459_v20  ;;  %v1479_v35 = vpop.eup %1478  ;;  %1494 = vpow2.f32 %v522_v48  ;;  %v3366_v20 = vld [vmem:[#allocation63_spill] sm:$0xff] }
 0x11b   : > { %vm861_vm10 = vcmp.eq.s32.totalorder %v2101_v47, %v2573_v63  ;;  %vm862_vm11 = vcmp.eq.s32.totalorder %v2115_v37, %v2573_v63  ;;  %vm850_vm12 = vcmp.eq.s32.totalorder %v2115_v37, %v2475_v62  ;;  %545 = vadd.xlane.f32.xlu0 %v544_v31  ;;  %v587_v3 = vadd.f32 %v2514_v16, %v2505_v44  ;;  %v1481_v53 = vpop.eup %1480 }
 0x11c   : > { %v592_v60 = vadd.f32 %v1473_v17, %v1471_v33  ;;  %v549_v14 = vadd.f32 %v3366_v20, %v548_v39  ;;  %v558_v38 = vadd.f32 %v3367_v54, %v557_v22  ;;  %v563_v48 = vadd.f32 %v3368_v52, %v562_v18  ;;  %v1483_v25 = vpop.eup %1482  ;;  %v3372_v17 = vld [vmem:[#allocation66_spill] sm:$0xff]  ;;  %v3373_v18 = vld [vmem:[#allocation36_spill] sm:$0xff] }
 0x11d   : > { %v568_v10 = vadd.f32 %v3369_v0, %v567_v45  ;;  %v554_v11 = vadd.f32 %v3370_v56, %v553_v40  ;;  %v573_v43 = vadd.f32 %v2477_v50, %v572_v46  ;;  %v578_v15 = vadd.f32 %v2431_v55, %v577_v58  ;;  %v1485_v59 = vpop.eup %1484  ;;  %v2640_v50 = vpop.permute.xlu1 %814  ;;  %v1535_v54 = vld [vmem:[%s1773_s23 + $0xd8] sm:$0xff]  ;;  %v1536_v0 = vld [vmem:[%s1773_s23 + $0x110] sm:$0xff]  ;;  %v1538_v56 = vld [vmem:[%s1773_s23 + $0x128] sm:$0xff] }
 0x11e   : > { %v597_v28 = vadd.f32 %v1469_v51, %v1467_v13  ;;  %1496 = vpow2.f32 %v530_v32  ;;  %vm857_vm13 = vcmp.eq.s32.totalorder %v2101_v47, %v2562_v41  ;;  %vm858_vm14 = vcmp.eq.s32.totalorder %v2115_v37, %v2562_v41  ;;  %550 = vadd.xlane.f32.xlu1 %v549_v14  ;;  %v2636_v16 = vpop.eup %1486  ;;  %v2652_v45 = vpop.permute.xlu0 %817  ;;  %v1532_v32 = vld [vmem:[%s1773_s23 + $0xd0] sm:$0xff] }
 0x11f   : > { %v583_v44 = vadd.f32 %v2551_v30, %v582_v7  ;;  %vm865_vm15 = vcmp.eq.s32.totalorder %v2101_v47, %v2605_v61  ;;  %555 = vadd.xlane.f32.xlu0 %v554_v11  ;;  %v588_v55 = vadd.f32 %v2521_v24, %v587_v3  ;;  %v593_v13 = vadd.f32 %v1477_v26, %v592_v60  ;;  %v3371_v30 = vld [vmem:[#allocation27_spill] sm:$0xff]  ;;  %v1534_v3 = vld [vmem:[%s1773_s23 + $0x108] sm:$0xff] }
 0x120   : > { %v602_v51 = vadd.f32 %v1481_v53, %v1479_v35  ;;  %v1489_v33 = vpop.eup %1488  ;;  %vm869_vm0 = vcmp.eq.s32.totalorder %v2101_v47, %v2618_v36  ;;  %vm870_vm1 = vcmp.eq.s32.totalorder %v2115_v37, %v2618_v36  ;;  %vm866_vm2 = vcmp.eq.s32.totalorder %v2115_v37, %v2605_v61 }
 0x121   : > { %v559_v39 = vadd.f32 %v3371_v30, %v558_v38  ;;  %v564_v22 = vadd.f32 %v3372_v17, %v563_v48  ;;  %v569_v24 = vadd.f32 %v3373_v18, %v568_v10  ;;  %v1491_v2 = vpop.eup %1490  ;;  %v574_v5 = vadd.f32 %v2482_v21, %v573_v43  ;;  %v2706_v20 = vpop.permute.xlu1 %820  ;;  %v2770_v30 = vld [vmem:[%s1773_s23 + $0x130] sm:$0xff]  ;;  %v2777_v17 = vld [vmem:[%s1773_s23 + $0x148] sm:$0xff]  ;;  %v2787_v18 = vld [vmem:[%s1773_s23 + $0x138] sm:$0xff] }
 0x122   : > { %v2656_v31 = vadd.f32 %v2438_v29, %v578_v15  ;;  %v598_v42 = vadd.f32 %v1475_v4, %v597_v28  ;;  %vm851_vm3 = vcmp.eq.s32.totalorder %v2122_v9, %v2475_v62  ;;  %vm873_vm4 = vcmp.eq.s32.totalorder %v2101_v47, %v2640_v50  ;;  %v1530_v29 = vld [vmem:[%s1773_s23 + $0xc0] sm:$0xff]  ;;  %v1531_v4 = vld [vmem:[%s1773_s23 + $0xc8] sm:$0xff]  ;;  %v2734_v43 = vpop.permute.xlu0 %823  ;;  %v2740_v28 = vld [vmem:[%s1773_s23 + $0x118] sm:$0xff] }
 0x123   : > { %vm874_vm5 = vcmp.eq.s32.totalorder %v2115_v37, %v2640_v50  ;;  %560 = vadd.xlane.f32.xlu1 %v559_v39  ;;  %v2665_v40 = vadd.f32 %v2557_v19, %v583_v44  ;;  %vm852_vm6 = vcmp.eq.s32.totalorder %v3322_v27, %v2475_v62  ;;  %v913_v21 = vsel %vm849_vm9, %v1530_v29, 0.0  ;;  %565 = vadd.xlane.f32.xlu0 %v564_v22  ;;  %v2684_v26 = vpop.eup %1492  ;;  %v1537_v62 = vld [vmem:[%s1773_s23 + $0x120] sm:$0xff] }
 0x124   : > { %v914_v46 = vsel %vm850_vm12, %v1531_v4, 0.0  ;;  %v2678_v1 = vadd.f32 %v2530_v57, %v588_v55  ;;  %v2680_v19 = vadd.f32 %v1485_v59, %v593_v13  ;;  %v603_v58 = vadd.f32 %v1489_v33, %v602_v51  ;;  %v1533_v57 = vld [vmem:[%s1773_s23 + $0x100] sm:$0xff]  ;;  %v1495_v53 = vpop.eup %1494  ;;  %v2820_v4 = vld [vmem:[%s1773_s23 + $0x168] sm:$0xff] }
 0x125   : > { %vm859_vm7 = vcmp.eq.s32.totalorder %v2122_v9, %v2562_v41  ;;  %v2690_v7 = vsel %vm851_vm3, %v1532_v32, 0.0  ;;  %vm860_vm8 = vcmp.eq.s32.totalorder %v3322_v27, %v2562_v41  ;;  %v921_v35 = vsel %vm857_vm13, %v1533_v57, 0.0  ;;  %v2759_v41 = vld [vmem:[%s1773_s23 + $0x140] sm:$0xff]  ;;  %v2831_v57 = vld [vmem:[%s1773_s23 + $0x170] sm:$0xff] }
 0x126   : > { %v922_v60 = vsel %vm858_vm14, %v1534_v3, 0.0  ;;  %vm877_vm9 = vcmp.eq.s32.totalorder %v2101_v47, %v2652_v45  ;;  %vm878_vm12 = vcmp.eq.s32.totalorder %v2115_v37, %v2652_v45  ;;  %v2708_v14 = vadd.f32 %v1483_v25, %v598_v42  ;;  %v2806_v42 = vld [vmem:[%s1773_s23 + $0x158] sm:$0xff]  ;;  %v2840_v3 = vld [vmem:[%s1773_s23 + $0x180] sm:$0xff] }
 0x127   : > { %v2714_v38 = vsel %vm852_vm6, %v1535_v54, 0.0  ;;  %v983_v52 = vadd.f32 %v914_v46, %v913_v21  ;;  %v993_v48 = vadd.f32 %v922_v60, %v921_v35  ;;  %vm853_vm13 = vcmp.eq.s32.totalorder %v2101_v47, %v2519_v8  ;;  %570 = vadd.xlane.f32.xlu1 %v569_v24  ;;  %575 = vadd.xlane.f32.xlu0 %v574_v5  ;;  %v2813_v21 = vld [vmem:[%s1773_s23 + $0x160] sm:$0xff] }
 0x128   : > { %vm854_vm14 = vcmp.eq.s32.totalorder %v2115_v37, %v2519_v8  ;;  %v923_v10 = vsel %vm859_vm7, %v1536_v0, 0.0  ;;  %vm863_vm3 = vcmp.eq.s32.totalorder %v2122_v9, %v2573_v63  ;;  %v925_v25 = vsel %vm861_vm10, %v1537_v62, 0.0  ;;  %v2748_v55 = vpop.eup %1496  ;;  %v2861_v62 = vld [vmem:[%s1773_s23 + $0x178] sm:$0xff] }
 0x129   : > { %v926_v11 = vsel %vm862_vm11, %v1538_v56, 0.0  ;;  %v2737_v15 = vadd.f32 %v1491_v2, %v2636_v16  ;;  %v924_v59 = vsel %vm860_vm8, %v2740_v28, 0.0  ;;  %v994_v44 = vadd.f32 %v993_v48, %v923_v10 }
 0x12a   : > { %vm864_vm10 = vcmp.eq.s32.totalorder %v3322_v27, %v2573_v63  ;;  %vm881_vm11 = vcmp.eq.s32.totalorder %v2101_v47, %v2706_v20  ;;  %vm882_vm6 = vcmp.eq.s32.totalorder %v2115_v37, %v2706_v20  ;;  %v998_v16 = vadd.f32 %v926_v11, %v925_v25  ;;  %v2874_v25 = vld [vmem:[%s1773_s23 + $0x190] sm:$0xff]  ;;  %v2888_v11 = vld [vmem:[%s1773_s23 + $0x1a8] sm:$0xff] }
 0x12b   : > { %vm867_vm7 = vcmp.eq.s32.totalorder %v2122_v9, %v2605_v61  ;;  %vm868_vm8 = vcmp.eq.s32.totalorder %v3322_v27, %v2605_v61  ;;  %v929_v13 = vsel %vm865_vm15, %v2759_v41, 0.0  ;;  %v2765_v51 = vadd.f32 %v1495_v53, %v603_v58  ;;  %580 = vadd.xlane.f32.xlu1 %v2656_v31  ;;  %585 = vadd.xlane.f32.xlu0 %v2665_v40  ;;  %v2799_v31 = vld [vmem:[%s1773_s23 + $0x150] sm:$0xff]  ;;  %v2847_v53 = vld [vmem:[%s1773_s23 + $0x188] sm:$0xff] }
 0x12c   : > { %v2767_v33 = vadd.f32 %v994_v44, %v924_v59  ;;  %v927_v39 = vsel %vm863_vm3, %v2770_v30, 0.0  ;;  %v930_v22 = vsel %vm866_vm2, %v2777_v17, 0.0  ;;  %vm885_vm15 = vcmp.eq.s32.totalorder %v2101_v47, %v2734_v43  ;;  %v1555_v44 = vld [vmem:[%s1773_s23 + $0xe0] sm:$0xff]  ;;  %v1565_v47 = vld [vmem:[%s1773_s23 + $0xf0] sm:$0xff] }
 0x12d   : > { %v928_v24 = vsel %vm864_vm10, %v2787_v18, 0.0  ;;  %v999_v2 = vadd.f32 %v998_v16, %v927_v39  ;;  %v1003_v5 = vadd.f32 %v930_v22, %v929_v13  ;;  %vm871_vm3 = vcmp.eq.s32.totalorder %v2122_v9, %v2618_v36  ;;  %v1556_v13 = vld [vmem:[%s1773_s23 + $0xe8] sm:$0xff] }
 0x12e   : > { %vm886_vm2 = vcmp.eq.s32.totalorder %v2115_v37, %v2734_v43  ;;  %v931_v63 = vsel %vm867_vm7, %v2799_v31, 0.0  ;;  %v932_v29 = vsel %vm868_vm8, %v2806_v42, 0.0  ;;  %v933_v40 = vsel %vm869_vm0, %v2813_v21, 0.0 }
 0x12f   : > { %v934_v46 = vsel %vm870_vm1, %v2820_v4, 0.0  ;;  %v2826_v58 = vadd.f32 %v999_v2, %v928_v24  ;;  %v1004_v32 = vadd.f32 %v1003_v5, %v931_v63  ;;  %vm872_vm10 = vcmp.eq.s32.totalorder %v3322_v27, %v2618_v36  ;;  %590 = vadd.xlane.f32.xlu1 %v2678_v1  ;;  %595 = vadd.xlane.f32.xlu0 %v2680_v19  ;;  %v2881_v36 = vld [vmem:[%s1773_s23 + $0x1a0] sm:$0xff]  ;;  %v2908_v2 = vld [vmem:[%s1773_s23 + $0x198] sm:$0xff]  ;;  %v2915_v63 = vld [vmem:[%s1773_s23 + $0x1b0] sm:$0xff] }
 0x130   : > { %v1008_v61 = vadd.f32 %v934_v46, %v933_v40  ;;  %v935_v35 = vsel %vm871_vm3, %v2831_v57, 0.0  ;;  %vm875_vm0 = vcmp.eq.s32.totalorder %v2122_v9, %v2640_v50  ;;  %v937_v60 = vsel %vm873_vm4, %v2840_v3, 0.0 }
 0x131   : > { %v938_v54 = vsel %vm874_vm5, %v2847_v53, 0.0  ;;  %v984_v48 = vadd.f32 %v983_v52, %v2690_v7  ;;  %vm855_vm1 = vcmp.eq.s32.totalorder %v2122_v9, %v2519_v8  ;;  %v2857_v0 = vadd.f32 %v1004_v32, %v932_v29 }
 0x132   : > { %v1009_v10 = vadd.f32 %v1008_v61, %v935_v35  ;;  %v936_v1 = vsel %vm872_vm10, %v2861_v62, 0.0  ;;  %vm876_vm4 = vcmp.eq.s32.totalorder %v3322_v27, %v2640_v50  ;;  %v1013_v7 = vadd.f32 %v938_v54, %v937_v60  ;;  %v1561_v61 = vld [vmem:[%s1773_s23 + $0x1b8] sm:$0xff] }
 0x133   : > { %vm879_vm5 = vcmp.eq.s32.totalorder %v2122_v9, %v2652_v45  ;;  %v939_v19 = vsel %vm875_vm0, %v2874_v25, 0.0  ;;  %v941_v56 = vsel %vm877_vm9, %v2881_v36, 0.0  ;;  %v942_v59 = vsel %vm878_vm12, %v2888_v11, 0.0  ;;  %600 = vadd.xlane.f32.xlu1 %v2708_v14  ;;  %605 = vadd.xlane.f32.xlu0 %v2765_v51 }
 0x134   : > { %v2871_v52 = vadd.f32 %v1009_v10, %v936_v1  ;;  %v917_v16 = vsel %vm853_vm13, %v1555_v44, 0.0  ;;  %v918_v39 = vsel %vm854_vm14, %v1556_v13, 0.0  ;;  %v1014_v22 = vadd.f32 %v1013_v7, %v939_v19  ;;  %v1562_v10 = vld [vmem:[%s1773_s23 + $0x1e0] sm:$0xff]  ;;  %v1563_v1 = vld [vmem:[%s1773_s23 + $0x1d0] sm:$0xff]  ;;  %v1564_v19 = vld [vmem:[%s1773_s23 + $0x1e8] sm:$0xff] }
 0x135   : > { %vm880_vm9 = vcmp.eq.s32.totalorder %v3322_v27, %v2652_v45  ;;  %v608_v24 = vadd.f32 %v2684_v26, %v2737_v15  ;;  %v940_v5 = vsel %vm876_vm4, %v2908_v2, 0.0  ;;  %v943_v29 = vsel %vm879_vm5, %v2915_v63, 0.0  ;;  %v2927_v26 = vld [vmem:[%s1773_s23 + $0x1c0] sm:$0xff]  ;;  %v2934_v15 = vld [vmem:[%s1773_s23 + $0x1c8] sm:$0xff] }
 0x136   : > { %v1018_v40 = vadd.f32 %v942_v59, %v941_v56  ;;  %v2922_v14 = vadd.f32 %v1014_v22, %v940_v5  ;;  %vm883_vm12 = vcmp.eq.s32.totalorder %v2122_v9, %v2706_v20  ;;  %v945_v50 = vsel %vm881_vm11, %v2927_v26, 0.0  ;;  %v1566_v22 = vld [vmem:[%s1773_s23 + $0x1d8] sm:$0xff]  ;;  %v1567_v5 = vld [vmem:[%s1773_s23 + $0x1f0] sm:$0xff] }
 0x137   : > { %v946_v51 = vsel %vm882_vm6, %v2934_v15, 0.0  ;;  %v985_v46 = vadd.f32 %v984_v48, %v2714_v38  ;;  %v988_v32 = vadd.f32 %v918_v39, %v917_v16  ;;  %v944_v35 = vsel %vm880_vm9, %v1561_v61, 0.0  ;;  %v3374_v48 = vld [vmem:[#allocation48_spill] sm:$0xff] }
 0x138   : > { %v1019_v60 = vadd.f32 %v1018_v40, %v943_v29  ;;  %vm884_vm13 = vcmp.eq.s32.totalorder %v3322_v27, %v2706_v20  ;;  %v1023_v54 = vadd.f32 %v946_v51, %v945_v50  ;;  %vm887_vm14 = vcmp.eq.s32.totalorder %v2122_v9, %v2734_v43  ;;  %693 = vadd.xlane.f32.xlu1 %v3374_v48 }
 0x139   : > { %v949_v38 = vsel %vm885_vm15, %v1562_v10, 0.0  ;;  %vm856_vm11 = vcmp.eq.s32.totalorder %v3322_v27, %v2519_v8  ;;  %v947_v7 = vsel %vm883_vm12, %v1563_v1, 0.0  ;;  %v950_v56 = vsel %vm886_vm2, %v1564_v19, 0.0  ;;  %986 = vadd.xlane.f32.xlu0 %v985_v46  ;;  %v1568_v46 = vld [vmem:[%s1773_s23 + $0x1f8] sm:$0xff] }
 0x13a   : > { %v1020_v45 = vadd.f32 %v1019_v60, %v944_v35  ;;  %v919_v59 = vsel %vm855_vm1, %v1565_v47, 0.0  ;;  %v1024_v44 = vadd.f32 %v1023_v54, %v947_v7  ;;  %vm888_vm6 = vcmp.eq.s32.totalorder %v3322_v27, %v2734_v43 }
 0x13b   : > { %v1028_v16 = vadd.f32 %v950_v56, %v949_v38  ;;  %v609_v13 = vadd.f32 %v2748_v55, %v608_v24  ;;  %v989_v39 = vadd.f32 %v988_v32, %v919_v59  ;;  %v948_v37 = vsel %vm884_vm13, %v1566_v22, 0.0  ;;  %v1569_v55 = vld [vmem:[%s1773_s23 + $0xf8] sm:$0xff] }
 0x13c   : > { %v951_v29 = vsel %vm887_vm14, %v1567_v5, 0.0  ;;  %v1025_v40 = vadd.f32 %v1024_v44, %v948_v37  ;;  %v702_v51 = vadd.f32 %v2740_v28, %v2586_v12  ;;  %v952_v35 = vsel %vm888_vm6, %v1568_v46, 0.0 }
 0x13d   : > { %v1029_v50 = vadd.f32 %v1028_v16, %v951_v29  ;;  %610 = vadd.xlane.f32.xlu1 %v609_v13  ;;  %698 = vadd.xlane.f32.xlu0 %v2570_v34  ;;  %v920_v20 = vsel %vm856_vm11, %v1569_v55, 0.0  ;;  %v706_v24 = vadd.f32 %v2770_v30, %v2595_v23  ;;  %v710_v9 = vadd.f32 %v2777_v17, %v2759_v41 }
 0x13e   : > { %v990_v32 = vadd.f32 %v989_v39, %v920_v20  ;;  %v715_v34 = vadd.f32 %v2820_v4, %v2813_v21  ;;  %v720_v23 = vadd.f32 %v2847_v53, %v2840_v3  ;;  %v725_v17 = vadd.f32 %v2888_v11, %v2881_v36  ;;  %v3012_v53 = vpop.xlane.xlu0 %663  ;;  %v3376_v39 = vld [vmem:[#allocation43_spill] sm:$0xff] }
 0x13f   : > { %v1030_v43 = vadd.f32 %v1029_v50, %v952_v35  ;;  %v707_v12 = vadd.f32 %v2787_v18, %v706_v24  ;;  %v711_v28 = vadd.f32 %v2799_v31, %v710_v9  ;;  %v730_v31 = vadd.f32 %v2934_v15, %v2927_v26  ;;  %v3377_v24 = vld [vmem:[#allocation41_spill] sm:$0xff] }
 0x140   : > { %v716_v8 = vadd.f32 %v2831_v57, %v715_v34  ;;  %v721_v30 = vadd.f32 %v2874_v25, %v720_v23  ;;  %v726_v18 = vadd.f32 %v2915_v63, %v725_v17  ;;  %v735_v4 = vadd.f32 %v1564_v19, %v1562_v10  ;;  %v3378_v34 = vld [vmem:[#allocation40_spill] sm:$0xff] }
 0x141   : > { %991 = vadd.xlane.f32.xlu1 %v990_v32  ;;  %703 = vadd.xlane.f32.xlu0 %v702_v51  ;;  %v712_v27 = vadd.f32 %v2806_v42, %v711_v28  ;;  %v731_v21 = vadd.f32 %v1563_v1, %v730_v31  ;;  %v3375_v10 = vlaneseq  ;;  %v3033_v56 = vstv %s1310_s18 }
 0x142   : > { %v717_v41 = vadd.f32 %v2861_v62, %v716_v8  ;;  %v727_v42 = vadd.f32 %v1561_v61, %v726_v18  ;;  %v736_v57 = vadd.f32 %v1567_v5, %v735_v4  ;;  %v3014_v62 = vpop.xlane.xlu0 %678 }
 0x143   : > { %v3029_v38 = vshrl.u32 %v3375_v10, 7 }
 0x144   : > { %v737_v3 = vadd.f32 %v1568_v46, %v736_v57 }
 0x145   : > { %996 = vadd.xlane.f32.xlu1 %v2767_v33  ;;  %708 = vadd.xlane.f32.xlu0 %v707_v12  ;;  %v722_v33 = vadd.f32 %v2908_v2, %v721_v30  ;;  %v1131_v7 = vadd.s32 8, %v3029_v38  ;;  %v1132_v59 = vadd.s32 16, %v3029_v38  ;;  %v1133_v16 = vadd.s32 24, %v3029_v38 }
 0x146   : > { %v3018_v25 = vpop.xlane.xlu0 %688  ;;  %v3043_v51 = vadd.s32 %v3033_v56, %v3029_v38  ;;  %v1134_v32 = vadd.s32 32, %v3029_v38  ;;  %v3055_v8 = vadd.s32 40, %v3029_v38 }
 0x147   : > { %v3039_v5 = vadd.s32 %v3033_v56, %v1131_v7  ;;  %v3046_v46 = vadd.s32 %v3033_v56, %v1132_v59 }
 0x148   : > { %vm1164_vm8 = vcmp.lt.s32.totalorder %v3043_v51, 300 }
 0x149   : > { %1001 = vadd.xlane.f32.xlu1 %v2826_v58  ;;  %713 = vadd.xlane.f32.xlu0 %v712_v27  ;;  %v732_v58 = vadd.f32 %v1566_v22, %v731_v21  ;;  %vm1165_vm7 = vcmp.lt.s32.totalorder %v3039_v5, 300  ;;  %vm1166_vm15 = vcmp.lt.s32.totalorder %v3046_v46, 300 }
 0x14d   : > { %1006 = vadd.xlane.f32.xlu1 %v2857_v0  ;;  %718 = vadd.xlane.f32.xlu0 %v717_v41  ;;  %v669_v0 = vpop.xlane.xlu1 %668 }
 0x151   : > { %1011 = vadd.xlane.f32.xlu1 %v2871_v52  ;;  %723 = vadd.xlane.f32.xlu0 %v722_v33  ;;  %v3016_v52 = vpop.xlane.xlu1 %673 }
 0x155   : > { %1016 = vadd.xlane.f32.xlu1 %v2922_v14  ;;  %728 = vadd.xlane.f32.xlu0 %v727_v42  ;;  %v3020_v36 = vpop.xlane.xlu1 %683 }
 0x159   : > { %1021 = vadd.xlane.f32.xlu1 %v1020_v45  ;;  %733 = vadd.xlane.f32.xlu0 %v732_v58 }
 0x15d   : > { %1026 = vadd.xlane.f32.xlu1 %v1025_v40  ;;  %738 = vadd.xlane.f32.xlu0 %v737_v3  ;;  %v3379_v3 = vld [vmem:[#allocation42_spill] sm:$0xff] }
 0x161   : > { %1031 = vadd.xlane.f32.xlu1 %v1030_v43  ;;  %v3050_v43 = vadd.s32 %v3033_v56, %v1133_v16 }
 0x163   : > { %vm1167_vm3 = vcmp.lt.s32.totalorder %v3050_v43, 300 }
 0x190   : > { %v962_v2 = vpop.xlane.xlu1 %961 }
 0x194   : > { %v957_v11 = vpop.xlane.xlu0 %956 }
 0x199   : > { %v3022_v14 = vpop.xlane.xlu1 %971 }
 0x19b   : > { %v967_v63 = vpop.xlane.xlu0 %966 }
 0x1a0   : > { %v3024_v26 = vpop.xlane.xlu0 %976 }
 0x1a3   : > { %v3026_v15 = vpop.xlane.xlu1 %981 }
 0x1a4   : > { %v541_v61 = vpop.xlane.xlu0 %540 }
 0x1a5   : > { %1498 = vlog2.f32 %v541_v61 }
 0x1a7   : > { %v536_v60 = vpop.xlane.xlu1 %535 }
 0x1a8   : > { %1500 = vlog2.f32 %v536_v60  ;;  %v546_v54 = vpop.xlane.xlu0 %545 }
 0x1a9   : > { %1502 = vlog2.f32 %v546_v54  ;;  %v3380_v54 = vld [vmem:[#allocation45_spill] sm:$0xff] }
 0x1ab   : > { %v551_v48 = vpop.xlane.xlu1 %550 }
 0x1ac   : > { %1504 = vlog2.f32 %v551_v48  ;;  %v556_v45 = vpop.xlane.xlu0 %555 }
 0x1ad   : > { %1506 = vlog2.f32 %v556_v45 }
 0x1af   : > { %v1499_v1 = vpop.eup %1498 }
 0x1b0   : > { %v561_v19 = vpop.xlane.xlu1 %560  ;;  %v615_v47 = vmul.f32 0.6931472, %v1499_v1  ;;  %v566_v44 = vpop.xlane.xlu0 %565 }
 0x1b1   : > { %1508 = vlog2.f32 %v561_v19 }
 0x1b2   : > { %v1501_v13 = vpop.eup %1500  ;;  %v645_v22 = vadd.f32 %v615_v47, %v3376_v39  ;;  %1510 = vlog2.f32 %v566_v44 }
 0x1b3   : > { %v1503_v37 = vpop.eup %1502  ;;  %v613_v29 = vmul.f32 0.6931472, %v1501_v13  ;;  %v3381_v13 = vld [vmem:[#allocation44_spill] sm:$0xff] }
 0x1b4   : > { %v571_v40 = vpop.xlane.xlu1 %570  ;;  %v741_v50 = vmul.f32 512.0, %v645_v22  ;;  %v617_v35 = vmul.f32 0.6931472, %v1503_v37  ;;  %v576_v55 = vpop.xlane.xlu0 %575  ;;  %v1034_v20 = vsub.f32 %v962_v2, %v645_v22 }
 0x1b5   : > { %v644_v9 = vadd.f32 %v613_v29, %v3377_v24  ;;  %1512 = vlog2.f32 %v571_v40 }
 0x1b6   : > { %v1505_v12 = vpop.eup %1504  ;;  %v757_v28 = vsub.f32 %v669_v0, %v741_v50  ;;  %v646_v27 = vadd.f32 %v617_v35, %v3378_v34  ;;  %1514 = vlog2.f32 %v576_v55  ;;  %v1082_v4 = vmul.f32 0.9, %v1034_v20 }
 0x1b7   : > { %v1507_v23 = vpop.eup %1506  ;;  %v740_v41 = vmul.f32 512.0, %v644_v9  ;;  %v1033_v30 = vsub.f32 %v957_v11, %v644_v9  ;;  %v619_v17 = vmul.f32 0.6931472, %v1505_v12 }
 0x1b8   : > { %v581_v33 = vpop.xlane.xlu1 %580  ;;  %v1050_v18 = vsub.f32 %v757_v28, %v1034_v20  ;;  %v742_v31 = vmul.f32 512.0, %v646_v27  ;;  %v621_v42 = vmul.f32 0.6931472, %v1507_v23  ;;  %v586_v21 = vpop.xlane.xlu0 %585  ;;  %v1035_v57 = vsub.f32 %v967_v63, %v646_v27 }
 0x1b9   : > { %v756_v58 = vsub.f32 %v3012_v53, %v740_v41  ;;  %v647_v0 = vadd.f32 %v619_v17, %v3379_v3  ;;  %v1081_v60 = vmul.f32 0.9, %v1033_v30  ;;  %1516 = vlog2.f32 %v581_v33 }
 0x1ba   : > { %v1066_v61 = vmul.f32 0.00019569472, %v1050_v18  ;;  %v758_v11 = vsub.f32 %v3016_v52, %v742_v31  ;;  %v648_v10 = vadd.f32 %v621_v42, %v3380_v54  ;;  %v1083_v29 = vmul.f32 0.9, %v1035_v57 }
 0x1bb   : > { %v1509_v2 = vpop.eup %1508  ;;  %v1049_v48 = vsub.f32 %v756_v58, %v1033_v30  ;;  %v743_v45 = vmul.f32 512.0, %v647_v0  ;;  %v1036_v53 = vsub.f32 %v3022_v14, %v647_v0  ;;  %v1152_v14 = vadd.s32 %v3033_v56, %v1134_v32 }
 0x1bc   : > { %v623_v1 = vmul.f32 0.6931472, %v1509_v2  ;;  %v591_v7 = vpop.xlane.xlu1 %590  ;;  %v1098_v19 = vadd.f32 %v1082_v4, %v1066_v61  ;;  %v1051_v47 = vsub.f32 %v758_v11, %v1035_v57  ;;  %v744_v63 = vmul.f32 512.0, %v648_v10  ;;  %v596_v59 = vpop.xlane.xlu0 %595 }
 0x1bd   : > { %v1065_v44 = vmul.f32 0.00019569472, %v1049_v48  ;;  %v759_v16 = vsub.f32 %v3014_v62, %v743_v45  ;;  %v1037_v52 = vsub.f32 %v3024_v26, %v648_v10  ;;  %v1511_v24 = vpop.eup %1510  ;;  %v1084_v12 = vmul.f32 0.9, %v1036_v53  ;;  %v3382_v48 = vld [vmem:[#allocation52_spill] sm:$0xff] }
 0x1be   : > { %v649_v39 = vadd.f32 %v623_v1, %v3381_v13  ;;  %v1114_v22 = vsub.f32 0.0, %v1098_v19  ;;  %v1067_v37 = vmul.f32 0.00019569472, %v1051_v47  ;;  %v760_v40 = vsub.f32 %v3020_v36, %v744_v63 }
 0x1bf   : > { %v1097_v50 = vadd.f32 %v1081_v60, %v1065_v44  ;;  %v1052_v35 = vsub.f32 %v759_v16, %v1036_v53  ;;  %v1513_v34 = vpop.eup %1512  ;;  %v1085_v41 = vmul.f32 0.9, %v1037_v52  ;;  %1518 = vlog2.f32 %v586_v21 }
 0x1c0   : > { %v745_v55 = vmul.f32 512.0, %v649_v39  ;;  %v601_v20 = vpop.xlane.xlu1 %600  ;;  %v1099_v9 = vadd.f32 %v1083_v29, %v1067_v37  ;;  %v1053_v28 = vsub.f32 %v760_v40, %v1037_v52  ;;  %v1038_v62 = vsub.f32 %v3026_v15, %v649_v39  ;;  %v606_v26 = vpop.xlane.xlu0 %605  ;;  %v3383_v52 = vld [vmem:[#allocation47_spill] sm:$0xff] }
 0x1c1   : > { %v1113_v27 = vsub.f32 0.0, %v1097_v50  ;;  %v1068_v23 = vmul.f32 0.00019569472, %v1052_v35  ;;  %v1515_v36 = vpop.eup %1514  ;;  %v1181_v17 = vsel %vm1165_vm7, %v1114_v22, 0.0  ;;  %v625_v15 = vmul.f32 0.6931472, %v1511_v24 }
 0x1c2   : > { %v761_v30 = vsub.f32 %v3018_v25, %v745_v55  ;;  %v1115_v33 = vsub.f32 0.0, %v1099_v9  ;;  %v1069_v18 = vmul.f32 0.00019569472, %v1053_v28  ;;  %v1086_v3 = vmul.f32 0.9, %v1038_v62  ;;  %v3384_v35 = vld [vmem:[#allocation58_spill] sm:$0xff] }
 0x1c3   : > { %v1180_v32 = vsel %vm1164_vm8, %v1113_v27, 0.0  ;;  %v1100_v31 = vadd.f32 %v1084_v12, %v1068_v23  ;;  %v1153_v25 = vadd.s32 %v3033_v56, %v3055_v8  ;;  %v1517_v2 = vpop.eup %1516  ;;  %1520 = vlog2.f32 %v591_v7  ;;  %v3385_v28 = vld [vmem:[#allocation50_spill] sm:$0xff] }
 0x1c4   : > { %v1054_v42 = vsub.f32 %v761_v30, %v1038_v62  ;;  %v1197_v58 = vadd.f32 %v1181_v17, %v1180_v32  ;;  %v1101_v57 = vadd.f32 %v1085_v41, %v1069_v18  ;;  %v1182_v5 = vsel %vm1166_vm15, %v1115_v33, 0.0  ;;  %v3386_v32 = vld [vmem:[#allocation61_spill] sm:$0xff] }
 0x1c5   : > { %v694_v4 = vpop.xlane.xlu1 %693  ;;  %v1116_v61 = vsub.f32 0.0, %v1100_v31  ;;  %vm1168_vm2 = vcmp.lt.s32.totalorder %v1152_v14, 300  ;;  %v627_v10 = vmul.f32 0.6931472, %v1513_v34  ;;  %v650_v45 = vadd.f32 %v625_v15, %v3382_v48 }
 0x1c6   : > { %v987_v0 = vpop.xlane.xlu0 %986  ;;  %v1070_v21 = vmul.f32 0.00019569472, %v1054_v42  ;;  %v1198_v51 = vadd.f32 %v1197_v58, %v1182_v5  ;;  %v1117_v60 = vsub.f32 0.0, %v1101_v57  ;;  %1522 = vlog2.f32 %v596_v59 }
 0x1c7   : > { %v1183_v11 = vsel %vm1167_vm3, %v1116_v61, 0.0  ;;  %vm1169_vm10 = vcmp.lt.s32.totalorder %v1153_v25, 300  ;;  %v629_v53 = vmul.f32 0.6931472, %v1515_v36  ;;  %v631_v7 = vmul.f32 0.6931472, %v1517_v2 }
 0x1c8   : > { %v1102_v54 = vadd.f32 %v1086_v3, %v1070_v21  ;;  %v1199_v8 = vadd.f32 %v1198_v51, %v1183_v11  ;;  %v1184_v47 = vsel %vm1168_vm2, %v1117_v60, 0.0  ;;  %v746_v44 = vmul.f32 512.0, %v650_v45  ;;  %v3387_v60 = vld [vmem:[#allocation54_spill] sm:$0xff] }
 0x1c9   : > { %v651_v13 = vadd.f32 %v627_v10, %v3383_v52  ;;  %v1519_v39 = vpop.eup %1518  ;;  %1524 = vlog2.f32 %v601_v20  ;;  %v1136_v59 = vadd.s32 48, %v3029_v38  ;;  %v1039_v40 = vsub.f32 %v987_v0, %v650_v45 }
 0x1ca   : > { %v611_v1 = vpop.xlane.xlu1 %610  ;;  %v699_v19 = vpop.xlane.xlu0 %698  ;;  %v1118_v46 = vsub.f32 0.0, %v1102_v54  ;;  %v1200_v63 = vadd.f32 %v1199_v8, %v1184_v47  ;;  %v762_v29 = vsub.f32 %v694_v4, %v746_v44  ;;  %v633_v50 = vmul.f32 0.6931472, %v1519_v39 }
 0x1cb   : > { %v652_v55 = vadd.f32 %v629_v53, %v3384_v35  ;;  %v747_v24 = vmul.f32 512.0, %v651_v13  ;;  %v653_v62 = vadd.f32 %v631_v7, %v3385_v28  ;;  %1526 = vlog2.f32 %v606_v26 }
 0x1cc   : > { %v1185_v16 = vsel %vm1169_vm10, %v1118_v46, 0.0  ;;  %v1137_v34 = vadd.s32 56, %v3029_v38  ;;  %v3092_v23 = vadd.s32 %v3033_v56, %v1136_v59  ;;  %v1055_v20 = vsub.f32 %v762_v29, %v1039_v40 }
 0x1cd   : > { %v3085_v22 = vadd.f32 %v1200_v63, %v1185_v16  ;;  %v1521_v14 = vpop.eup %1520  ;;  %v763_v41 = vsub.f32 %v699_v19, %v747_v24  ;;  %v1138_v30 = vadd.s32 64, %v3029_v38  ;;  %v748_v33 = vmul.f32 512.0, %v652_v55  ;;  %v3388_v16 = vld [vmem:[#allocation25_spill] sm:$0xff] }
 0x1ce   : > { %v992_v43 = vpop.xlane.xlu1 %991  ;;  %v704_v37 = vpop.xlane.xlu0 %703  ;;  %v635_v17 = vmul.f32 0.6931472, %v1521_v14  ;;  %v654_v31 = vadd.f32 %v633_v50, %v3386_v32  ;;  %v749_v15 = vmul.f32 512.0, %v653_v62  ;;  %1528 = vlog2.f32 %v611_v1 }
 0x1cf   : > { %v1040_v9 = vsub.f32 %v992_v43, %v651_v13  ;;  %v3097_v26 = vadd.s32 %v3033_v56, %v1137_v34  ;;  %v764_v58 = vsub.f32 %v704_v37, %v748_v33  ;;  %v1139_v57 = vadd.s32 72, %v3029_v38  ;;  %v3389_v33 = vld [vmem:[#allocation59_spill] sm:$0xff] }
 0x1d0   : > { %v1523_v36 = vpop.eup %1522  ;;  %v1071_v0 = vmul.f32 0.00019569472, %v1055_v20  ;;  %vm1170_vm0 = vcmp.lt.s32.totalorder %v3092_v23, 300  ;;  %v3102_v61 = vadd.s32 %v3033_v56, %v1138_v30  ;;  %v750_v51 = vmul.f32 512.0, %v654_v31 }
 0x1d1   : > { %v1056_v42 = vsub.f32 %v763_v41, %v1040_v9  ;;  %v637_v25 = vmul.f32 0.6931472, %v1523_v36  ;;  %v655_v11 = vadd.f32 %v635_v17, %v3387_v60  ;;  %v1087_v10 = vmul.f32 0.9, %v1039_v40 }
 0x1d2   : > { %v997_v12 = vpop.xlane.xlu1 %996  ;;  %v709_v27 = vpop.xlane.xlu0 %708  ;;  %v1140_v1 = vadd.s32 80, %v3029_v38  ;;  %v3107_v19 = vadd.s32 %v3033_v56, %v1139_v57  ;;  %v1141_v63 = vadd.s32 88, %v3029_v38  ;;  %vm1171_vm1 = vcmp.lt.s32.totalorder %v3097_v26, 300 }
 0x1d3   : > { %v1041_v18 = vsub.f32 %v997_v12, %v652_v55  ;;  %v765_v2 = vsub.f32 %v709_v27, %v749_v15  ;;  %v1525_v54 = vpop.eup %1524  ;;  %v1072_v48 = vmul.f32 0.00019569472, %v1056_v42  ;;  %v1103_v7 = vadd.f32 %v1087_v10, %v1071_v0 }
 0x1d4   : > { %v1088_v44 = vmul.f32 0.9, %v1040_v9  ;;  %v656_v52 = vadd.f32 %v637_v25, %v3388_v16  ;;  %v639_v43 = vmul.f32 0.6931472, %v1525_v54  ;;  %v751_v29 = vmul.f32 512.0, %v655_v11 }
 0x1d5   : > { %v1057_v21 = vsub.f32 %v764_v58, %v1041_v18  ;;  %v1527_v13 = vpop.eup %1526  ;;  %vm1172_vm4 = vcmp.lt.s32.totalorder %v3102_v61, 300  ;;  %v3114_v50 = vadd.s32 %v3033_v56, %v1140_v1  ;;  %v1142_v55 = vadd.s32 96, %v3029_v38 }
 0x1d6   : > { %v1002_v4 = vpop.xlane.xlu1 %1001  ;;  %v714_v3 = vpop.xlane.xlu0 %713  ;;  %v1104_v59 = vadd.f32 %v1088_v44, %v1072_v48  ;;  %v1089_v14 = vmul.f32 0.9, %v1041_v18  ;;  %vm1173_vm5 = vcmp.lt.s32.totalorder %v3107_v19, 300  ;;  %v3119_v9 = vadd.s32 %v3033_v56, %v1141_v63 }
 0x1d7   : > { %v1042_v5 = vsub.f32 %v1002_v4, %v653_v62  ;;  %v766_v46 = vsub.f32 %v714_v3, %v750_v51  ;;  %v1073_v39 = vmul.f32 0.00019569472, %v1057_v21  ;;  %v641_v62 = vmul.f32 0.6931472, %v1527_v13 }
 0x1d8   : > { %v1119_v34 = vsub.f32 0.0, %v1103_v7  ;;  %v752_v20 = vmul.f32 512.0, %v656_v52  ;;  %v1529_v41 = vpop.eup %1528  ;;  %v657_v32 = vadd.f32 %v639_v43, %v3389_v33  ;;  %vm1174_vm9 = vcmp.lt.s32.totalorder %v3114_v50, 300 }
 0x1d9   : > { %v1058_v45 = vsub.f32 %v765_v2, %v1042_v5  ;;  %v1090_v27 = vmul.f32 0.9, %v1042_v5  ;;  %v1105_v30 = vadd.f32 %v1089_v14, %v1073_v39  ;;  %v3124_v42 = vadd.s32 %v3033_v56, %v1142_v55 }
 0x1da   : > { %v1007_v8 = vpop.xlane.xlu1 %1006  ;;  %v719_v53 = vpop.xlane.xlu0 %718  ;;  %vm1175_vm12 = vcmp.lt.s32.totalorder %v3119_v9, 300  ;;  %v1186_v0 = vsel %vm1170_vm0, %v1119_v34, 0.0  ;;  %v643_v2 = vmul.f32 0.6931472, %v1529_v41  ;;  %v658_v21 = vadd.f32 %v641_v62, %v2323_v49 }
 0x1db   : > { %v1043_v47 = vsub.f32 %v1007_v8, %v654_v31  ;;  %v1074_v40 = vmul.f32 0.00019569472, %v1058_v45  ;;  %v767_v24 = vsub.f32 %v719_v53, %v751_v29  ;;  %v1120_v31 = vsub.f32 0.0, %v1104_v59 }
 0x1dc   : > { %v1121_v51 = vsub.f32 0.0, %v1105_v30  ;;  %v753_v54 = vmul.f32 512.0, %v657_v32  ;;  %v1143_v1 = vadd.s32 104, %v3029_v38  ;;  %v1202_v7 = vadd.f32 %v3085_v22, %v1186_v0 }
 0x1dd   : > { %v1059_v37 = vsub.f32 %v766_v46, %v1043_v47  ;;  %v1106_v18 = vadd.f32 %v1090_v27, %v1074_v40  ;;  %v1091_v4 = vmul.f32 0.9, %v1043_v47  ;;  %v1187_v10 = vsel %vm1171_vm1, %v1120_v31, 0.0 }
 0x1de   : > { %v1012_v35 = vpop.xlane.xlu1 %1011  ;;  %v724_v28 = vpop.xlane.xlu0 %723  ;;  %v754_v49 = vmul.f32 512.0, %v658_v21  ;;  %v1144_v44 = vadd.s32 112, %v3029_v38  ;;  %v659_v16 = vadd.f32 %v643_v2, %v2221_v6  ;;  %v1188_v26 = vsel %vm1172_vm4, %v1121_v51, 0.0 }
 0x1df   : > { %v1044_v12 = vsub.f32 %v1012_v35, %v655_v11  ;;  %v1075_v36 = vmul.f32 0.00019569472, %v1059_v37  ;;  %v768_v57 = vsub.f32 %v724_v28, %v752_v20  ;;  %v1122_v48 = vsub.f32 0.0, %v1106_v18 }
 0x1e0   : > { %v1203_v39 = vadd.f32 %v1202_v7, %v1187_v10  ;;  %vm1176_vm13 = vcmp.lt.s32.totalorder %v3124_v42, 300  ;;  %v1161_v61 = vadd.s32 %v3033_v56, %v1143_v1  ;;  %v1145_v30 = vadd.s32 120, %v3029_v38 }
 0x1e1   : > { %v1060_v17 = vsub.f32 %v767_v24, %v1044_v12  ;;  %v1092_v5 = vmul.f32 0.9, %v1044_v12  ;;  %v1107_v60 = vadd.f32 %v1091_v4, %v1075_v36  ;;  %v1189_v37 = vsel %vm1173_vm5, %v1122_v48, 0.0 }
 0x1e2   : > { %v1017_v15 = vpop.xlane.xlu1 %1016  ;;  %v729_v25 = vpop.xlane.xlu0 %728  ;;  %v1204_v6 = vadd.f32 %v1203_v39, %v1188_v26  ;;  %v1162_v24 = vadd.s32 %v3033_v56, %v1144_v44  ;;  %v755_v12 = vmul.f32 512.0, %v659_v16  ;;  %vm1177_vm14 = vcmp.lt.s32.totalorder %v1161_v61, 300 }
 0x1e3   : > { %v1076_v58 = vmul.f32 0.00019569472, %v1060_v17  ;;  %v1045_v3 = vsub.f32 %v1017_v15, %v656_v52  ;;  %v769_v23 = vsub.f32 %v729_v25, %v753_v54  ;;  %v1123_v52 = vsub.f32 0.0, %v1107_v60 }
 0x1e4   : > { %v1205_v27 = vadd.f32 %v1204_v6, %v1189_v37  ;;  %vm1178_vm11 = vcmp.lt.s32.totalorder %v1162_v24, 300  ;;  %v1163_v9 = vadd.s32 %v3033_v56, %v1145_v30  ;;  %vm1219_vm7 = vcmask 0  }
 0x1e5   : > { %v1061_v11 = vsub.f32 %v768_v57, %v1045_v3  ;;  %v1108_v45 = vadd.f32 %v1092_v5, %v1076_v58  ;;  %v1093_v47 = vmul.f32 0.9, %v1045_v3  ;;  %v1190_v28 = vsel %vm1174_vm9, %v1123_v52, 0.0 }
 0x1e6   : > { %v1022_v8 = vpop.xlane.xlu1 %1021  ;;  %v734_v63 = vpop.xlane.xlu0 %733  ;;  %v1206_v18 = vadd.f32 %v1205_v27, %v1190_v28  ;;  %vm1179_vm6 = vcmp.lt.s32.totalorder %v1163_v9, 300 }
 0x1e7   : > { %v1077_v46 = vmul.f32 0.00019569472, %v1061_v11  ;;  %v1046_v53 = vsub.f32 %v1022_v8, %v657_v32  ;;  %v1124_v29 = vsub.f32 0.0, %v1108_v45  ;;  %v770_v35 = vsub.f32 %v734_v63, %v754_v49  ;;  %v1196_v8 = vld [vmem:[#allocation5] sm:$0x1] }
 0x1e9   : > { %v1109_v13 = vadd.f32 %v1093_v47, %v1077_v46  ;;  %v1062_v43 = vsub.f32 %v769_v23, %v1046_v53  ;;  %v1094_v40 = vmul.f32 0.9, %v1046_v53  ;;  %v1191_v20 = vsel %vm1175_vm12, %v1124_v29, 0.0 }
 0x1ea   : > { %v1027_v59 = vpop.xlane.xlu1 %1026  ;;  %v739_v14 = vpop.xlane.xlu0 %738  ;;  %v1207_v58 = vadd.f32 %v1206_v18, %v1191_v20 }
 0x1eb   : > { %v1078_v22 = vmul.f32 0.00019569472, %v1062_v43  ;;  %v1047_v55 = vsub.f32 %v1027_v59, %v658_v21  ;;  %v1125_v19 = vsub.f32 0.0, %v1109_v13  ;;  %v771_v41 = vsub.f32 %v739_v14, %v755_v12 }
 0x1ed   : > { %v1110_v62 = vadd.f32 %v1094_v40, %v1078_v22  ;;  %v1063_v34 = vsub.f32 %v770_v35, %v1047_v55  ;;  %v1095_v32 = vmul.f32 0.9, %v1047_v55  ;;  %v1192_v50 = vsel %vm1176_vm13, %v1125_v19, 0.0 }
 0x1ee   : > { %v1032_v36 = vpop.xlane.xlu1 %1031  ;;  %v1208_v0 = vadd.f32 %v1207_v58, %v1192_v50 }
 0x1ef   : > { %v1126_v17 = vsub.f32 0.0, %v1110_v62  ;;  %v1079_v33 = vmul.f32 0.00019569472, %v1063_v34  ;;  %v1048_v31 = vsub.f32 %v1032_v36, %v659_v16 }
 0x1f1   : > { %v1111_v15 = vadd.f32 %v1095_v32, %v1079_v33  ;;  %v1064_v4 = vsub.f32 %v771_v41, %v1048_v31  ;;  %v1193_v57 = vsel %vm1177_vm14, %v1126_v17, 0.0  ;;  %v1096_v38 = vmul.f32 0.9, %v1048_v31 }
 0x1f2   : > { %v1209_v21 = vadd.f32 %v1208_v0, %v1193_v57 }
 0x1f3   : > { %v1127_v3 = vsub.f32 0.0, %v1111_v15  ;;  %v1080_v25 = vmul.f32 0.00019569472, %v1064_v4 }
 0x1f5   : > { %v1194_v2 = vsel %vm1178_vm11, %v1127_v3, 0.0  ;;  %v1112_v5 = vadd.f32 %v1096_v38, %v1080_v25 }
 0x1f6   : > { %v1210_v60 = vadd.f32 %v1209_v21, %v1194_v2 }
 0x1f7   : > { %v1128_v51 = vsub.f32 0.0, %v1112_v5 }
 0x1f9   : > { %v1195_v11 = vsel %vm1179_vm6, %v1128_v51, 0.0 }
 0x1fa   : > { %v1211_v42 = vadd.f32 %v1210_v60, %v1195_v11 }
 0x1fc   : > { %v1212_v54 = vrot.slane %v1211_v42, 4 }
 0x1fe   : > { %v1213_v10 = vadd.f32 %v1212_v54, %v1211_v42 }
 0x200   : > { %v1214_v48 = vrot.slane %v1213_v10, 2 }
 0x202   : > { %v1215_v45 = vadd.f32 %v1214_v48, %v1213_v10 }
 0x204   : > { %v1216_v1 = vrot.slane %v1215_v45, 1  ;;  %1224 = sbr.rel (%p1311_p7) target bundleno = 533 (0x215), region = 40 }
 0x206   : > { %v1217_v56 = vadd.f32 %v1216_v1, %v1215_v45 }
 0x208   : > { %v1218_v46 = vadd.f32 %v1217_v56, %v1196_v8 }
 0x20a   : > { %1220 = vst.msk [vmem:[#allocation5] sm:$0x1] %vm1219_vm7, %v1218_v46 }
 0x211   : > { %v1225_v47 = vld [vmem:[#allocation5] sm:$0x1] }
 0x212   : > { %v1227_v23 = vmul.f32 0.0033333334, %v1225_v47 }
 0x214   : > { %1228 = vst.msk [vmem:[#allocation5] sm:$0x1] %vm1219_vm7, %v1227_v23 }
 0x215 PF: > { %p1329_p4 = scmp.eq.s32.totalorder %s1706_s13, 2  ;;  %s1671_s28 = smov [#allocation5]  }
 0x216   : > { %s1236_s29 = sshll.u32 %s1671_s28, 4  ;;  %s1237_s29 = int_to_ptr.vmem [resolvable:$true] %s1236_s29 }
 0x217   : > { %s1600_s30 = scalar_lea.vmem %s1237_s29, 16  ;;  %s1606_s3 = scalar_lea.vmem %s1237_s29, 32 }
 0x218   : > { %p1601_p5 = scmp.ne.s32.totalorder %s1237_s29, %s1600_s30  ;;  %p1607_p12 = scmp.lt.s32.totalorder %s1237_s29, %s1237_s29 }
 0x219   : > { %p1608_p0 = scmp.lt.s32.totalorder %s1606_s3, %s1600_s30 }
 0x21a   : > { %p1602_p6 = pnand %p1601_p5, %p1329_p4 }
 0x21b   : > { %p1609_p1 = por %p1608_p0, %p1607_p12 }
 0x21c   : > { %p1603_p10 = pneg %p1602_p6 }
 0x21e   : > { %p1610_p2 = pnand %p1609_p1, %p1603_p10 }
 0x220   : > { %1613 = shalt.err (!%p1610_p2)
}
 0x221   : > { %s1614_s6 = scalar_lea.hbm %s3190_s2, 16 }
 0x222   : > { %p1615_p11 = scmp.ne.s32.totalorder %s3190_s2, %s1614_s6  ;;  %p1620_p9 = scmp.lt.u32.totalorder %s1614_s6, %s3190_s2 }
 0x224   : > { %p1616_p13 = pnand %p1615_p11, %p1329_p4 }
 0x226   : > { %p1617_p3 = pneg %p1616_p13 }
 0x228   : > { %p1622_p8 = pnand %p1620_p9, %p1617_p3 }
 0x22a   : > { %1625 = shalt.err (!%p1622_p8)
}
 0x22b   : > { %1321 = dma.vmem_to_hbm [thread:$0]  (%p1329_p4), %s1237_s29, 16, %s3190_s2, [#allocation4]  }
 0x22c   : > { %1647 = dma.done.wait (%p1329_p4), [#allocation4], 16  }
 0x22d   : > { %1649 = vsyncadd (%p1329_p4), [#allocation4], 4294967280 }
 0x22e PF: > { %p13_p7 = scmp.ge.s32.totalorder %s1709_s14, 5   ;;  %s3390_s9 = smov %s1656_s10 }
 0x22f   : > { %s3391_s10 = smov %s1660_s11  ;;  %s3392_s11 = smov %s1719_s17 }
 0x230   : > { %s3393_s12 = smov %s1709_s14  ;;  %15 = sbr.rel (!%p13_p7) target bundleno = 4 (0x4), region = 76 }
 0x237   :  { %1249 = vsyncpa [#allocation3], 1 }
 0x238   :  { %1251 = vsyncpa [#allocation3 + $0x1], 1 }
 0x239   :  { %1252 = vsyncpa [#allocation4], 1 }
 0x23a   :  { %1254 = vsyncpa [#allocation4 + $0x1], 1 }

</bundles_post_ra>
